<compile_context>
chip_gen: v6e
topology: v6e:2x2x1
jax: 0.10.0
libtpu: 0.0.40
codegen_flags: <defaults>
</compile_context>

<pallas_src>
import math

import jax
import jax.numpy as jnp
from jax.experimental import pallas as pl
from jax.experimental.pallas import tpu as pltpu

LN_EPS = 1e-5

# 48 MiB scoped VMEM is legal on every current generation (v5e/v6e: 128 MiB physical,
# v7x: 64 MiB per TensorCore) and far above the 16/32 MiB defaults.  Tiles are modeled
# against 75% of it; at these tile sizes the kernel is already within a few percent of
# the HBM roofline on all three generations, so chasing the last MiBs of v6e VMEM via a
# hardware query is not worth the portability risk.
VMEM_LIMIT_BYTES = 48 * 1024 * 1024
VMEM_TILE_BUDGET = int(VMEM_LIMIT_BYTES * 0.75)
TEMP_FACTOR = 4  # matmul result + LN temporaries (+ possible MXU operand relayout)


def _ru(a, b):
    return ((a + b - 1) // b) * b


def _layer_norm(y, g, b, eps):
    mean = jnp.mean(y, axis=-1, keepdims=True)
    cen = y - mean
    var = jnp.mean(cen * cen, axis=-1, keepdims=True)
    return cen * jax.lax.rsqrt(var + eps) * g + b


def _make_kernel(xpack, D, eps):
    """Fused Linear(bias=False) + LayerNorm.

    xpack == 1 : x block is (tm, C); one dot; LN; lane-packed store via reshape.
    xpack  > 1 : x block is (tm/xpack, xpack*C) (lane-dense) and the weight is the
                 block-diagonal expansion, so one dot yields the already lane-packed
                 (tm/xpack, xpack*D) result; LN is applied per D-wide lane group and
                 written straight into the output block (keeps temporaries small).
    """

    def kernel(x_ref, w_ref, g_ref, b_ref, o_ref):
        y = jnp.dot(x_ref[...], w_ref[...], preferred_element_type=jnp.float32)
        g = g_ref[...]
        b = b_ref[...]
        if xpack == 1:
            out = _layer_norm(y, g, b, eps)
            o_ref[...] = out.reshape(o_ref.shape).astype(o_ref.dtype)
        else:
            for j in range(xpack):  # static unroll; each group is consumed by its store
                yj = y[:, j * D:(j + 1) * D]
                o_ref[:, j * D:(j + 1) * D] = _layer_norm(yj, g, b, eps).astype(o_ref.dtype)

    return kernel


def input_embedding_forward(x, w, gamma, beta, *, max_rows_per_tile=None):
    """InputEmbedding forward (branch_layers=['linear'], no pos-embedding, eval dropout).

    x: (B, L, C) f32.  w: (C, D) (transpose of the torch Linear weight).
    gamma/beta: (D,) LayerNorm affine.  Returns (y, [y]) with y = LN(x @ w)*gamma + beta.
    """
    B, L, C = x.shape
    Cw, D = w.shape
    assert Cw == C
    M = B * L
    isz = 4  # f32

    # ---- lane-packing factors (all host-side reshapes below are free bitcasts) -------
    xpack = 1
    if C < 128 and 128 % C == 0 and (128 // C) <= 16 and M % (128 // C) == 0:
        xpack = 128 // C
    if xpack > 1:
        qpack = xpack  # output packs with the same factor (lanes j*D..(j+1)*D = row j)
    else:
        qpack = 1
        if D < 128 and 128 % D == 0 and M % (128 // D) == 0:
            qpack = 128 // D

    x2d = x.reshape(M, C)
    if xpack > 1:
        x_in = x2d.reshape(M // xpack, xpack * C)          # (M/p, 128): lane-dense
        w_in = jnp.kron(jnp.eye(xpack, dtype=w.dtype), w)  # block-diag (p*C, p*D)
    else:
        x_in = x2d
        w_in = w
    g2d = gamma.reshape(1, D)
    b2d = beta.reshape(1, D)

    x_rows, x_width = x_in.shape
    o_rows, o_width = M // qpack, qpack * D
    w_rows, w_cols = w_in.shape

    # ---- tile-row selection against an accurate VMEM model ---------------------------
    unit = 8 * (xpack * qpack // math.gcd(xpack, qpack))  # sublane-legal row granule

    def footprint(tm):  # VMEM bytes for tm rows (lane padding to 128 included)
        xb = 2 * (tm // xpack) * _ru(x_width, 128) * isz               # x, double-buffered
        ob = 2 * (tm // qpack) * _ru(o_width, 128) * isz               # out, double-buffered
        tb = TEMP_FACTOR * (tm // qpack) * _ru(o_width, 128) * isz     # temporaries
        return xb + ob + tb

    fixed = (2 * _ru(w_rows, 8) * _ru(w_cols, 128) * isz               # resident weight (x2)
             + 4 * 8 * _ru(D, 128) * isz                               # gamma / beta
             + (2 << 20))                                              # slack
    avail = max(VMEM_TILE_BUDGET - fixed, footprint(unit))
    tm = unit * max(1, avail // footprint(unit))
    tm = min(tm, _ru(M, unit))
    if max_rows_per_tile is not None:
        tm = min(tm, _ru(max_rows_per_tile, unit))
    tm = max(tm, unit)

    num_tiles = pl.cdiv(M, tm)
    if num_tiles == 1:
        # Whole problem in one step: full-extent blocks (no 8/128 or ragged concerns).
        grid = (1,)
        x_spec = pl.BlockSpec((x_rows, x_width), lambda i: (0, 0))
        o_spec = pl.BlockSpec((o_rows, o_width), lambda i: (0, 0))
    else:
        if num_tiles % 2:                       # even grid -> 2-TensorCore balance (v7x)
            num_tiles += 1
        tm = min(tm, _ru(pl.cdiv(M, num_tiles), unit))
        num_tiles = pl.cdiv(M, tm)
        grid = (num_tiles,)
        # The last block may run past M: rows are independent, so out-of-bounds reads
        # only pollute rows whose writes are dropped at the boundary -> no pad / slice.
        x_spec = pl.BlockSpec((tm // xpack, x_width), lambda i: (i, 0))
        o_spec = pl.BlockSpec((tm // qpack, o_width), lambda i: (i, 0))

    cost = pl.CostEstimate(
        flops=2 * M * C * D,
        transcendentals=0,
        bytes_accessed=isz * (M * C + C * D + 2 * D + M * D),
    )

    out_packed = pl.pallas_call(
        _make_kernel(xpack, D, LN_EPS),
        out_shape=jax.ShapeDtypeStruct((o_rows, o_width), x.dtype),
        grid_spec=pltpu.PrefetchScalarGridSpec(
            num_scalar_prefetch=0,
            grid=grid,
            in_specs=[
                x_spec,                                            # x row-tile (lane-dense)
                pl.BlockSpec((w_rows, w_cols), lambda i: (0, 0)),  # VMEM-resident weight
                pl.BlockSpec((1, D), lambda i: (0, 0)),            # LayerNorm gamma
                pl.BlockSpec((1, D), lambda i: (0, 0)),            # LayerNorm beta
            ],
            out_specs=o_spec,                                      # lane-dense output slab
        ),
        compiler_params=pltpu.CompilerParams(
            dimension_semantics=("parallel",),
            vmem_limit_bytes=VMEM_LIMIT_BYTES,
        ),
        cost_estimate=cost,
    )(x_in, w_in, g2d, b2d)

    # Un-pack the lane-dense slab: rows are contiguous, pure re-chunk (no data movement).
    y = out_packed.reshape(M, D).reshape(B, L, D)

    # TokenEmbedding returns (x, latent_list=[x]); InputEmbedding passes both through
    # (use_pos_embedding='False' -> no positional term, dropout = identity at inference).
    return y, [y]


def _reference(x, w, gamma, beta):
    y = jnp.einsum("blc,cd->bld", x, w, precision=jax.lax.Precision.HIGHEST)
    mean = jnp.mean(y, axis=-1, keepdims=True)
    var = jnp.mean((y - mean) ** 2, axis=-1, keepdims=True)
    return (y - mean) * jax.lax.rsqrt(var + LN_EPS) * gamma + beta


if __name__ == "__main__":
    key = jax.random.PRNGKey(0)
    kx, kw = jax.random.split(key, 2)

    # Module-consistent small config: in_dim(C)=8, d_model(D)=32, n_window(L)=16, B=2.
    C, D = 8, 32
    # kaiming_normal_(mode='fan_in', a=0) on nn.Linear weight (D, C): std = sqrt(2/C);
    # stored transposed as (C, D).
    std = math.sqrt(2.0 / C)
    w_torch_layout = std * jax.random.normal(kw, (D, C), dtype=jnp.float32)
    w = w_torch_layout.T
    gamma = jnp.ones((D,), dtype=jnp.float32)   # LayerNorm weight
    beta = jnp.zeros((D,), dtype=jnp.float32)   # LayerNorm bias

    cases = [
        # (B, L, max_rows_per_tile, tol): covers packed/unpacked x, single/multi-tile
        # grids, even-grid balancing and ragged (clipped) last blocks.
        (2, 16, None, 1e-4),    # packed x (M % 16 == 0), single full-extent block
        (2, 2100, None, 2e-4),  # unpacked x (M % 16 != 0), packed out, single block
        (4, 1040, 768, 2e-4),   # packed x, 6-step grid, ragged last block
        (2, 2100, 512, 2e-4),   # unpacked x, 10-step grid (odd->even), ragged last block
    ]
    keys = jax.random.split(kx, len(cases))
    for (B, L, cap, tol), kk in zip(cases, keys):
        xin = jax.random.normal(kk, (B, L, C), dtype=jnp.float32)
        y, latents = input_embedding_forward(xin, w, gamma, beta, max_rows_per_tile=cap)
        y = jax.block_until_ready(y)
        ref = _reference(xin, w, gamma, beta)
        assert y.shape == (B, L, D)
        assert len(latents) == 1 and latents[0].shape == (B, L, D)
        assert jnp.allclose(y, ref, atol=tol, rtol=tol), (
            f"mismatch B={B} L={L} cap={cap}: "
            f"max_err={float(jnp.max(jnp.abs(y - ref)))}")

    print("KERNEL_OK")
</pallas_src>

<mosaic_0001>
module attributes {stable_mosaic.version = 11 : i64} {
  func.func @kernel(%arg0: i32, %arg1: memref<2x128xf32, #tpu.memory_space<vmem>>, %arg2: memref<128x512xf32, #tpu.memory_space<vmem>>, %arg3: memref<1x32xf32, #tpu.memory_space<vmem>>, %arg4: memref<1x32xf32, #tpu.memory_space<vmem>>, %arg5: memref<2x512xf32, #tpu.memory_space<vmem>>) attributes {dimension_semantics = [#tpu.dimension_semantics<parallel>], iteration_bounds = array<i64: 1>, scalar_prefetch = 0 : i64, scratch_operands = 0 : i64, tpu.core_type = #tpu.core_type<tc>, window_params = [{pipeline_mode = #tpu.pipeline_mode<synchronous>, transform_indices = @transform_0, window_bounds = array<i64: 2, 128>}, {pipeline_mode = #tpu.pipeline_mode<synchronous>, transform_indices = @transform_1, window_bounds = array<i64: 128, 512>}, {pipeline_mode = #tpu.pipeline_mode<synchronous>, transform_indices = @transform_2, window_bounds = array<i64: 1, 32>}, {pipeline_mode = #tpu.pipeline_mode<synchronous>, transform_indices = @transform_3, window_bounds = array<i64: 1, 32>}, {pipeline_mode = #tpu.pipeline_mode<synchronous>, transform_indices = @transform_4, window_bounds = array<i64: 2, 512>}]} {
    %c0 = arith.constant 0 : index
    %c0_0 = arith.constant 0 : index
    %0 = vector.load %arg1[%c0, %c0_0] : memref<2x128xf32, #tpu.memory_space<vmem>>, vector<2x128xf32>
    %c0_1 = arith.constant 0 : index
    %c0_2 = arith.constant 0 : index
    %1 = vector.load %arg2[%c0_1, %c0_2] : memref<128x512xf32, #tpu.memory_space<vmem>>, vector<128x512xf32>
    %cst = arith.constant dense<0.000000e+00> : vector<2x512xf32>
    %2 = tpu.matmul %0, %1, %cst {dimension_numbers = #tpu.dot_dimension_numbers<[1], [0], [0], [1], [0, 0, 1, 1], [], []>} : vector<2x128xf32>, vector<128x512xf32>, vector<2x512xf32> -> vector<2x512xf32>
    %c0_3 = arith.constant 0 : index
    %c0_4 = arith.constant 0 : index
    %3 = vector.load %arg3[%c0_3, %c0_4] : memref<1x32xf32, #tpu.memory_space<vmem>>, vector<1x32xf32>
    %c0_5 = arith.constant 0 : index
    %c0_6 = arith.constant 0 : index
    %4 = vector.load %arg4[%c0_5, %c0_6] : memref<1x32xf32, #tpu.memory_space<vmem>>, vector<1x32xf32>
    %5 = vector.extract_strided_slice %2 {offsets = [0, 0], sizes = [2, 32], strides = [1, 1]} : vector<2x512xf32> to vector<2x32xf32>
    %cst_7 = arith.constant dense<0.000000e+00> : vector<2xf32>
    %6 = vector.multi_reduction <add>, %5, %cst_7 [1] : vector<2x32xf32> to vector<2xf32>
    %7 = vector.shape_cast %6 : vector<2xf32> to vector<2x1xf32>
    %cst_8 = arith.constant 3.200000e+01 : f32
    %8 = vector.broadcast %cst_8 : f32 to vector<2x1xf32>
    %9 = arith.divf %7, %8 : vector<2x1xf32>
    %10 = vector.broadcast %9 : vector<2x1xf32> to vector<2x32xf32>
    %11 = arith.subf %5, %10 : vector<2x32xf32>
    %12 = arith.mulf %11, %11 : vector<2x32xf32>
    %cst_9 = arith.constant dense<0.000000e+00> : vector<2xf32>
    %13 = vector.multi_reduction <add>, %12, %cst_9 [1] : vector<2x32xf32> to vector<2xf32>
    %14 = vector.shape_cast %13 : vector<2xf32> to vector<2x1xf32>
    %cst_10 = arith.constant 3.200000e+01 : f32
    %15 = vector.broadcast %cst_10 : f32 to vector<2x1xf32>
    %16 = arith.divf %14, %15 : vector<2x1xf32>
    %cst_11 = arith.constant 9.99999974E-6 : f32
    %17 = vector.broadcast %cst_11 : f32 to vector<2x1xf32>
    %18 = arith.addf %16, %17 : vector<2x1xf32>
    %19 = math.rsqrt %18 : vector<2x1xf32>
    %20 = vector.broadcast %19 : vector<2x1xf32> to vector<2x32xf32>
    %21 = arith.mulf %11, %20 : vector<2x32xf32>
    %22 = vector.broadcast %3 : vector<1x32xf32> to vector<2x32xf32>
    %23 = arith.mulf %21, %22 : vector<2x32xf32>
    %24 = vector.broadcast %4 : vector<1x32xf32> to vector<2x32xf32>
    %25 = arith.addf %23, %24 : vector<2x32xf32>
    %c0_12 = arith.constant 0 : index
    %c0_13 = arith.constant 0 : index
    %26 = vector.load %arg5[%c0_12, %c0_13] : memref<2x512xf32, #tpu.memory_space<vmem>>, vector<2x32xf32>
    tpu.vector_store %arg5[%c0_12, %c0_13], %25 {strides = array<i32>} : memref<2x512xf32, #tpu.memory_space<vmem>>, vector<2x32xf32>,
    %27 = vector.extract_strided_slice %2 {offsets = [0, 32], sizes = [2, 32], strides = [1, 1]} : vector<2x512xf32> to vector<2x32xf32>
    %cst_14 = arith.constant dense<0.000000e+00> : vector<2xf32>
    %28 = vector.multi_reduction <add>, %27, %cst_14 [1] : vector<2x32xf32> to vector<2xf32>
    %29 = vector.shape_cast %28 : vector<2xf32> to vector<2x1xf32>
    %cst_15 = arith.constant 3.200000e+01 : f32
    %30 = vector.broadcast %cst_15 : f32 to vector<2x1xf32>
    %31 = arith.divf %29, %30 : vector<2x1xf32>
    %32 = vector.broadcast %31 : vector<2x1xf32> to vector<2x32xf32>
    %33 = arith.subf %27, %32 : vector<2x32xf32>
    %34 = arith.mulf %33, %33 : vector<2x32xf32>
    %cst_16 = arith.constant dense<0.000000e+00> : vector<2xf32>
    %35 = vector.multi_reduction <add>, %34, %cst_16 [1] : vector<2x32xf32> to vector<2xf32>
    %36 = vector.shape_cast %35 : vector<2xf32> to vector<2x1xf32>
    %cst_17 = arith.constant 3.200000e+01 : f32
    %37 = vector.broadcast %cst_17 : f32 to vector<2x1xf32>
    %38 = arith.divf %36, %37 : vector<2x1xf32>
    %cst_18 = arith.constant 9.99999974E-6 : f32
    %39 = vector.broadcast %cst_18 : f32 to vector<2x1xf32>
    %40 = arith.addf %38, %39 : vector<2x1xf32>
    %41 = math.rsqrt %40 : vector<2x1xf32>
    %42 = vector.broadcast %41 : vector<2x1xf32> to vector<2x32xf32>
    %43 = arith.mulf %33, %42 : vector<2x32xf32>
    %44 = vector.broadcast %3 : vector<1x32xf32> to vector<2x32xf32>
    %45 = arith.mulf %43, %44 : vector<2x32xf32>
    %46 = vector.broadcast %4 : vector<1x32xf32> to vector<2x32xf32>
    %47 = arith.addf %45, %46 : vector<2x32xf32>
    %c0_19 = arith.constant 0 : index
    %c32 = arith.constant 32 : index
    %48 = vector.load %arg5[%c0_19, %c32] : memref<2x512xf32, #tpu.memory_space<vmem>>, vector<2x32xf32>
    tpu.vector_store %arg5[%c0_19, %c32], %47 {strides = array<i32>} : memref<2x512xf32, #tpu.memory_space<vmem>>, vector<2x32xf32>,
    %49 = vector.extract_strided_slice %2 {offsets = [0, 64], sizes = [2, 32], strides = [1, 1]} : vector<2x512xf32> to vector<2x32xf32>
    %cst_20 = arith.constant dense<0.000000e+00> : vector<2xf32>
    %50 = vector.multi_reduction <add>, %49, %cst_20 [1] : vector<2x32xf32> to vector<2xf32>
    %51 = vector.shape_cast %50 : vector<2xf32> to vector<2x1xf32>
    %cst_21 = arith.constant 3.200000e+01 : f32
    %52 = vector.broadcast %cst_21 : f32 to vector<2x1xf32>
    %53 = arith.divf %51, %52 : vector<2x1xf32>
    %54 = vector.broadcast %53 : vector<2x1xf32> to vector<2x32xf32>
    %55 = arith.subf %49, %54 : vector<2x32xf32>
    %56 = arith.mulf %55, %55 : vector<2x32xf32>
    %cst_22 = arith.constant dense<0.000000e+00> : vector<2xf32>
    %57 = vector.multi_reduction <add>, %56, %cst_22 [1] : vector<2x32xf32> to vector<2xf32>
    %58 = vector.shape_cast %57 : vector<2xf32> to vector<2x1xf32>
    %cst_23 = arith.constant 3.200000e+01 : f32
    %59 = vector.broadcast %cst_23 : f32 to vector<2x1xf32>
    %60 = arith.divf %58, %59 : vector<2x1xf32>
    %cst_24 = arith.constant 9.99999974E-6 : f32
    %61 = vector.broadcast %cst_24 : f32 to vector<2x1xf32>
    %62 = arith.addf %60, %61 : vector<2x1xf32>
    %63 = math.rsqrt %62 : vector<2x1xf32>
    %64 = vector.broadcast %63 : vector<2x1xf32> to vector<2x32xf32>
    %65 = arith.mulf %55, %64 : vector<2x32xf32>
    %66 = vector.broadcast %3 : vector<1x32xf32> to vector<2x32xf32>
    %67 = arith.mulf %65, %66 : vector<2x32xf32>
    %68 = vector.broadcast %4 : vector<1x32xf32> to vector<2x32xf32>
    %69 = arith.addf %67, %68 : vector<2x32xf32>
    %c0_25 = arith.constant 0 : index
    %c64 = arith.constant 64 : index
    %70 = vector.load %arg5[%c0_25, %c64] : memref<2x512xf32, #tpu.memory_space<vmem>>, vector<2x32xf32>
    tpu.vector_store %arg5[%c0_25, %c64], %69 {strides = array<i32>} : memref<2x512xf32, #tpu.memory_space<vmem>>, vector<2x32xf32>,
    %71 = vector.extract_strided_slice %2 {offsets = [0, 96], sizes = [2, 32], strides = [1, 1]} : vector<2x512xf32> to vector<2x32xf32>
    %cst_26 = arith.constant dense<0.000000e+00> : vector<2xf32>
    %72 = vector.multi_reduction <add>, %71, %cst_26 [1] : vector<2x32xf32> to vector<2xf32>
    %73 = vector.shape_cast %72 : vector<2xf32> to vector<2x1xf32>
    %cst_27 = arith.constant 3.200000e+01 : f32
    %74 = vector.broadcast %cst_27 : f32 to vector<2x1xf32>
    %75 = arith.divf %73, %74 : vector<2x1xf32>
    %76 = vector.broadcast %75 : vector<2x1xf32> to vector<2x32xf32>
    %77 = arith.subf %71, %76 : vector<2x32xf32>
    %78 = arith.mulf %77, %77 : vector<2x32xf32>
    %cst_28 = arith.constant dense<0.000000e+00> : vector<2xf32>
    %79 = vector.multi_reduction <add>, %78, %cst_28 [1] : vector<2x32xf32> to vector<2xf32>
    %80 = vector.shape_cast %79 : vector<2xf32> to vector<2x1xf32>
    %cst_29 = arith.constant 3.200000e+01 : f32
    %81 = vector.broadcast %cst_29 : f32 to vector<2x1xf32>
    %82 = arith.divf %80, %81 : vector<2x1xf32>
    %cst_30 = arith.constant 9.99999974E-6 : f32
    %83 = vector.broadcast %cst_30 : f32 to vector<2x1xf32>
    %84 = arith.addf %82, %83 : vector<2x1xf32>
    %85 = math.rsqrt %84 : vector<2x1xf32>
    %86 = vector.broadcast %85 : vector<2x1xf32> to vector<2x32xf32>
    %87 = arith.mulf %77, %86 : vector<2x32xf32>
    %88 = vector.broadcast %3 : vector<1x32xf32> to vector<2x32xf32>
    %89 = arith.mulf %87, %88 : vector<2x32xf32>
    %90 = vector.broadcast %4 : vector<1x32xf32> to vector<2x32xf32>
    %91 = arith.addf %89, %90 : vector<2x32xf32>
    %c0_31 = arith.constant 0 : index
    %c96 = arith.constant 96 : index
    %92 = vector.load %arg5[%c0_31, %c96] : memref<2x512xf32, #tpu.memory_space<vmem>>, vector<2x32xf32>
    tpu.vector_store %arg5[%c0_31, %c96], %91 {strides = array<i32>} : memref<2x512xf32, #tpu.memory_space<vmem>>, vector<2x32xf32>,
    %93 = vector.extract_strided_slice %2 {offsets = [0, 128], sizes = [2, 32], strides = [1, 1]} : vector<2x512xf32> to vector<2x32xf32>
    %cst_32 = arith.constant dense<0.000000e+00> : vector<2xf32>
    %94 = vector.multi_reduction <add>, %93, %cst_32 [1] : vector<2x32xf32> to vector<2xf32>
    %95 = vector.shape_cast %94 : vector<2xf32> to vector<2x1xf32>
    %cst_33 = arith.constant 3.200000e+01 : f32
    %96 = vector.broadcast %cst_33 : f32 to vector<2x1xf32>
    %97 = arith.divf %95, %96 : vector<2x1xf32>
    %98 = vector.broadcast %97 : vector<2x1xf32> to vector<2x32xf32>
    %99 = arith.subf %93, %98 : vector<2x32xf32>
    %100 = arith.mulf %99, %99 : vector<2x32xf32>
    %cst_34 = arith.constant dense<0.000000e+00> : vector<2xf32>
    %101 = vector.multi_reduction <add>, %100, %cst_34 [1] : vector<2x32xf32> to vector<2xf32>
    %102 = vector.shape_cast %101 : vector<2xf32> to vector<2x1xf32>
    %cst_35 = arith.constant 3.200000e+01 : f32
    %103 = vector.broadcast %cst_35 : f32 to vector<2x1xf32>
    %104 = arith.divf %102, %103 : vector<2x1xf32>
    %cst_36 = arith.constant 9.99999974E-6 : f32
    %105 = vector.broadcast %cst_36 : f32 to vector<2x1xf32>
    %106 = arith.addf %104, %105 : vector<2x1xf32>
    %107 = math.rsqrt %106 : vector<2x1xf32>
    %108 = vector.broadcast %107 : vector<2x1xf32> to vector<2x32xf32>
    %109 = arith.mulf %99, %108 : vector<2x32xf32>
    %110 = vector.broadcast %3 : vector<1x32xf32> to vector<2x32xf32>
    %111 = arith.mulf %109, %110 : vector<2x32xf32>
    %112 = vector.broadcast %4 : vector<1x32xf32> to vector<2x32xf32>
    %113 = arith.addf %111, %112 : vector<2x32xf32>
    %c0_37 = arith.constant 0 : index
    %c128 = arith.constant 128 : index
    %114 = vector.load %arg5[%c0_37, %c128] : memref<2x512xf32, #tpu.memory_space<vmem>>, vector<2x32xf32>
    tpu.vector_store %arg5[%c0_37, %c128], %113 {strides = array<i32>} : memref<2x512xf32, #tpu.memory_space<vmem>>, vector<2x32xf32>,
    %115 = vector.extract_strided_slice %2 {offsets = [0, 160], sizes = [2, 32], strides = [1, 1]} : vector<2x512xf32> to vector<2x32xf32>
    %cst_38 = arith.constant dense<0.000000e+00> : vector<2xf32>
    %116 = vector.multi_reduction <add>, %115, %cst_38 [1] : vector<2x32xf32> to vector<2xf32>
    %117 = vector.shape_cast %116 : vector<2xf32> to vector<2x1xf32>
    %cst_39 = arith.constant 3.200000e+01 : f32
    %118 = vector.broadcast %cst_39 : f32 to vector<2x1xf32>
    %119 = arith.divf %117, %118 : vector<2x1xf32>
    %120 = vector.broadcast %119 : vector<2x1xf32> to vector<2x32xf32>
    %121 = arith.subf %115, %120 : vector<2x32xf32>
    %122 = arith.mulf %121, %121 : vector<2x32xf32>
    %cst_40 = arith.constant dense<0.000000e+00> : vector<2xf32>
    %123 = vector.multi_reduction <add>, %122, %cst_40 [1] : vector<2x32xf32> to vector<2xf32>
    %124 = vector.shape_cast %123 : vector<2xf32> to vector<2x1xf32>
    %cst_41 = arith.constant 3.200000e+01 : f32
    %125 = vector.broadcast %cst_41 : f32 to vector<2x1xf32>
    %126 = arith.divf %124, %125 : vector<2x1xf32>
    %cst_42 = arith.constant 9.99999974E-6 : f32
    %127 = vector.broadcast %cst_42 : f32 to vector<2x1xf32>
    %128 = arith.addf %126, %127 : vector<2x1xf32>
    %129 = math.rsqrt %128 : vector<2x1xf32>
    %130 = vector.broadcast %129 : vector<2x1xf32> to vector<2x32xf32>
    %131 = arith.mulf %121, %130 : vector<2x32xf32>
    %132 = vector.broadcast %3 : vector<1x32xf32> to vector<2x32xf32>
    %133 = arith.mulf %131, %132 : vector<2x32xf32>
    %134 = vector.broadcast %4 : vector<1x32xf32> to vector<2x32xf32>
    %135 = arith.addf %133, %134 : vector<2x32xf32>
    %c0_43 = arith.constant 0 : index
    %c160 = arith.constant 160 : index
    %136 = vector.load %arg5[%c0_43, %c160] : memref<2x512xf32, #tpu.memory_space<vmem>>, vector<2x32xf32>
    tpu.vector_store %arg5[%c0_43, %c160], %135 {strides = array<i32>} : memref<2x512xf32, #tpu.memory_space<vmem>>, vector<2x32xf32>,
    %137 = vector.extract_strided_slice %2 {offsets = [0, 192], sizes = [2, 32], strides = [1, 1]} : vector<2x512xf32> to vector<2x32xf32>
    %cst_44 = arith.constant dense<0.000000e+00> : vector<2xf32>
    %138 = vector.multi_reduction <add>, %137, %cst_44 [1] : vector<2x32xf32> to vector<2xf32>
    %139 = vector.shape_cast %138 : vector<2xf32> to vector<2x1xf32>
    %cst_45 = arith.constant 3.200000e+01 : f32
    %140 = vector.broadcast %cst_45 : f32 to vector<2x1xf32>
    %141 = arith.divf %139, %140 : vector<2x1xf32>
    %142 = vector.broadcast %141 : vector<2x1xf32> to vector<2x32xf32>
    %143 = arith.subf %137, %142 : vector<2x32xf32>
    %144 = arith.mulf %143, %143 : vector<2x32xf32>
    %cst_46 = arith.constant dense<0.000000e+00> : vector<2xf32>
    %145 = vector.multi_reduction <add>, %144, %cst_46 [1] : vector<2x32xf32> to vector<2xf32>
    %146 = vector.shape_cast %145 : vector<2xf32> to vector<2x1xf32>
    %cst_47 = arith.constant 3.200000e+01 : f32
    %147 = vector.broadcast %cst_47 : f32 to vector<2x1xf32>
    %148 = arith.divf %146, %147 : vector<2x1xf32>
    %cst_48 = arith.constant 9.99999974E-6 : f32
    %149 = vector.broadcast %cst_48 : f32 to vector<2x1xf32>
    %150 = arith.addf %148, %149 : vector<2x1xf32>
    %151 = math.rsqrt %150 : vector<2x1xf32>
    %152 = vector.broadcast %151 : vector<2x1xf32> to vector<2x32xf32>
    %153 = arith.mulf %143, %152 : vector<2x32xf32>
    %154 = vector.broadcast %3 : vector<1x32xf32> to vector<2x32xf32>
    %155 = arith.mulf %153, %154 : vector<2x32xf32>
    %156 = vector.broadcast %4 : vector<1x32xf32> to vector<2x32xf32>
    %157 = arith.addf %155, %156 : vector<2x32xf32>
    %c0_49 = arith.constant 0 : index
    %c192 = arith.constant 192 : index
    %158 = vector.load %arg5[%c0_49, %c192] : memref<2x512xf32, #tpu.memory_space<vmem>>, vector<2x32xf32>
    tpu.vector_store %arg5[%c0_49, %c192], %157 {strides = array<i32>} : memref<2x512xf32, #tpu.memory_space<vmem>>, vector<2x32xf32>,
    %159 = vector.extract_strided_slice %2 {offsets = [0, 224], sizes = [2, 32], strides = [1, 1]} : vector<2x512xf32> to vector<2x32xf32>
    %cst_50 = arith.constant dense<0.000000e+00> : vector<2xf32>
    %160 = vector.multi_reduction <add>, %159, %cst_50 [1] : vector<2x32xf32> to vector<2xf32>
    %161 = vector.shape_cast %160 : vector<2xf32> to vector<2x1xf32>
    %cst_51 = arith.constant 3.200000e+01 : f32
    %162 = vector.broadcast %cst_51 : f32 to vector<2x1xf32>
    %163 = arith.divf %161, %162 : vector<2x1xf32>
    %164 = vector.broadcast %163 : vector<2x1xf32> to vector<2x32xf32>
    %165 = arith.subf %159, %164 : vector<2x32xf32>
    %166 = arith.mulf %165, %165 : vector<2x32xf32>
    %cst_52 = arith.constant dense<0.000000e+00> : vector<2xf32>
    %167 = vector.multi_reduction <add>, %166, %cst_52 [1] : vector<2x32xf32> to vector<2xf32>
    %168 = vector.shape_cast %167 : vector<2xf32> to vector<2x1xf32>
    %cst_53 = arith.constant 3.200000e+01 : f32
    %169 = vector.broadcast %cst_53 : f32 to vector<2x1xf32>
    %170 = arith.divf %168, %169 : vector<2x1xf32>
    %cst_54 = arith.constant 9.99999974E-6 : f32
    %171 = vector.broadcast %cst_54 : f32 to vector<2x1xf32>
    %172 = arith.addf %170, %171 : vector<2x1xf32>
    %173 = math.rsqrt %172 : vector<2x1xf32>
    %174 = vector.broadcast %173 : vector<2x1xf32> to vector<2x32xf32>
    %175 = arith.mulf %165, %174 : vector<2x32xf32>
    %176 = vector.broadcast %3 : vector<1x32xf32> to vector<2x32xf32>
    %177 = arith.mulf %175, %176 : vector<2x32xf32>
    %178 = vector.broadcast %4 : vector<1x32xf32> to vector<2x32xf32>
    %179 = arith.addf %177, %178 : vector<2x32xf32>
    %c0_55 = arith.constant 0 : index
    %c224 = arith.constant 224 : index
    %180 = vector.load %arg5[%c0_55, %c224] : memref<2x512xf32, #tpu.memory_space<vmem>>, vector<2x32xf32>
    tpu.vector_store %arg5[%c0_55, %c224], %179 {strides = array<i32>} : memref<2x512xf32, #tpu.memory_space<vmem>>, vector<2x32xf32>,
    %181 = vector.extract_strided_slice %2 {offsets = [0, 256], sizes = [2, 32], strides = [1, 1]} : vector<2x512xf32> to vector<2x32xf32>
    %cst_56 = arith.constant dense<0.000000e+00> : vector<2xf32>
    %182 = vector.multi_reduction <add>, %181, %cst_56 [1] : vector<2x32xf32> to vector<2xf32>
    %183 = vector.shape_cast %182 : vector<2xf32> to vector<2x1xf32>
    %cst_57 = arith.constant 3.200000e+01 : f32
    %184 = vector.broadcast %cst_57 : f32 to vector<2x1xf32>
    %185 = arith.divf %183, %184 : vector<2x1xf32>
    %186 = vector.broadcast %185 : vector<2x1xf32> to vector<2x32xf32>
    %187 = arith.subf %181, %186 : vector<2x32xf32>
    %188 = arith.mulf %187, %187 : vector<2x32xf32>
    %cst_58 = arith.constant dense<0.000000e+00> : vector<2xf32>
    %189 = vector.multi_reduction <add>, %188, %cst_58 [1] : vector<2x32xf32> to vector<2xf32>
    %190 = vector.shape_cast %189 : vector<2xf32> to vector<2x1xf32>
    %cst_59 = arith.constant 3.200000e+01 : f32
    %191 = vector.broadcast %cst_59 : f32 to vector<2x1xf32>
    %192 = arith.divf %190, %191 : vector<2x1xf32>
    %cst_60 = arith.constant 9.99999974E-6 : f32
    %193 = vector.broadcast %cst_60 : f32 to vector<2x1xf32>
    %194 = arith.addf %192, %193 : vector<2x1xf32>
    %195 = math.rsqrt %194 : vector<2x1xf32>
    %196 = vector.broadcast %195 : vector<2x1xf32> to vector<2x32xf32>
    %197 = arith.mulf %187, %196 : vector<2x32xf32>
    %198 = vector.broadcast %3 : vector<1x32xf32> to vector<2x32xf32>
    %199 = arith.mulf %197, %198 : vector<2x32xf32>
    %200 = vector.broadcast %4 : vector<1x32xf32> to vector<2x32xf32>
    %201 = arith.addf %199, %200 : vector<2x32xf32>
    %c0_61 = arith.constant 0 : index
    %c256 = arith.constant 256 : index
    %202 = vector.load %arg5[%c0_61, %c256] : memref<2x512xf32, #tpu.memory_space<vmem>>, vector<2x32xf32>
    tpu.vector_store %arg5[%c0_61, %c256], %201 {strides = array<i32>} : memref<2x512xf32, #tpu.memory_space<vmem>>, vector<2x32xf32>,
    %203 = vector.extract_strided_slice %2 {offsets = [0, 288], sizes = [2, 32], strides = [1, 1]} : vector<2x512xf32> to vector<2x32xf32>
    %cst_62 = arith.constant dense<0.000000e+00> : vector<2xf32>
    %204 = vector.multi_reduction <add>, %203, %cst_62 [1] : vector<2x32xf32> to vector<2xf32>
    %205 = vector.shape_cast %204 : vector<2xf32> to vector<2x1xf32>
    %cst_63 = arith.constant 3.200000e+01 : f32
    %206 = vector.broadcast %cst_63 : f32 to vector<2x1xf32>
    %207 = arith.divf %205, %206 : vector<2x1xf32>
    %208 = vector.broadcast %207 : vector<2x1xf32> to vector<2x32xf32>
    %209 = arith.subf %203, %208 : vector<2x32xf32>
    %210 = arith.mulf %209, %209 : vector<2x32xf32>
    %cst_64 = arith.constant dense<0.000000e+00> : vector<2xf32>
    %211 = vector.multi_reduction <add>, %210, %cst_64 [1] : vector<2x32xf32> to vector<2xf32>
    %212 = vector.shape_cast %211 : vector<2xf32> to vector<2x1xf32>
    %cst_65 = arith.constant 3.200000e+01 : f32
    %213 = vector.broadcast %cst_65 : f32 to vector<2x1xf32>
    %214 = arith.divf %212, %213 : vector<2x1xf32>
    %cst_66 = arith.constant 9.99999974E-6 : f32
    %215 = vector.broadcast %cst_66 : f32 to vector<2x1xf32>
    %216 = arith.addf %214, %215 : vector<2x1xf32>
    %217 = math.rsqrt %216 : vector<2x1xf32>
    %218 = vector.broadcast %217 : vector<2x1xf32> to vector<2x32xf32>
    %219 = arith.mulf %209, %218 : vector<2x32xf32>
    %220 = vector.broadcast %3 : vector<1x32xf32> to vector<2x32xf32>
    %221 = arith.mulf %219, %220 : vector<2x32xf32>
    %222 = vector.broadcast %4 : vector<1x32xf32> to vector<2x32xf32>
    %223 = arith.addf %221, %222 : vector<2x32xf32>
    %c0_67 = arith.constant 0 : index
    %c288 = arith.constant 288 : index
    %224 = vector.load %arg5[%c0_67, %c288] : memref<2x512xf32, #tpu.memory_space<vmem>>, vector<2x32xf32>
    tpu.vector_store %arg5[%c0_67, %c288], %223 {strides = array<i32>} : memref<2x512xf32, #tpu.memory_space<vmem>>, vector<2x32xf32>,
    %225 = vector.extract_strided_slice %2 {offsets = [0, 320], sizes = [2, 32], strides = [1, 1]} : vector<2x512xf32> to vector<2x32xf32>
    %cst_68 = arith.constant dense<0.000000e+00> : vector<2xf32>
    %226 = vector.multi_reduction <add>, %225, %cst_68 [1] : vector<2x32xf32> to vector<2xf32>
    %227 = vector.shape_cast %226 : vector<2xf32> to vector<2x1xf32>
    %cst_69 = arith.constant 3.200000e+01 : f32
    %228 = vector.broadcast %cst_69 : f32 to vector<2x1xf32>
    %229 = arith.divf %227, %228 : vector<2x1xf32>
    %230 = vector.broadcast %229 : vector<2x1xf32> to vector<2x32xf32>
    %231 = arith.subf %225, %230 : vector<2x32xf32>
    %232 = arith.mulf %231, %231 : vector<2x32xf32>
    %cst_70 = arith.constant dense<0.000000e+00> : vector<2xf32>
    %233 = vector.multi_reduction <add>, %232, %cst_70 [1] : vector<2x32xf32> to vector<2xf32>
    %234 = vector.shape_cast %233 : vector<2xf32> to vector<2x1xf32>
    %cst_71 = arith.constant 3.200000e+01 : f32
    %235 = vector.broadcast %cst_71 : f32 to vector<2x1xf32>
    %236 = arith.divf %234, %235 : vector<2x1xf32>
    %cst_72 = arith.constant 9.99999974E-6 : f32
    %237 = vector.broadcast %cst_72 : f32 to vector<2x1xf32>
    %238 = arith.addf %236, %237 : vector<2x1xf32>
    %239 = math.rsqrt %238 : vector<2x1xf32>
    %240 = vector.broadcast %239 : vector<2x1xf32> to vector<2x32xf32>
    %241 = arith.mulf %231, %240 : vector<2x32xf32>
    %242 = vector.broadcast %3 : vector<1x32xf32> to vector<2x32xf32>
    %243 = arith.mulf %241, %242 : vector<2x32xf32>
    %244 = vector.broadcast %4 : vector<1x32xf32> to vector<2x32xf32>
    %245 = arith.addf %243, %244 : vector<2x32xf32>
    %c0_73 = arith.constant 0 : index
    %c320 = arith.constant 320 : index
    %246 = vector.load %arg5[%c0_73, %c320] : memref<2x512xf32, #tpu.memory_space<vmem>>, vector<2x32xf32>
    tpu.vector_store %arg5[%c0_73, %c320], %245 {strides = array<i32>} : memref<2x512xf32, #tpu.memory_space<vmem>>, vector<2x32xf32>,
    %247 = vector.extract_strided_slice %2 {offsets = [0, 352], sizes = [2, 32], strides = [1, 1]} : vector<2x512xf32> to vector<2x32xf32>
    %cst_74 = arith.constant dense<0.000000e+00> : vector<2xf32>
    %248 = vector.multi_reduction <add>, %247, %cst_74 [1] : vector<2x32xf32> to vector<2xf32>
    %249 = vector.shape_cast %248 : vector<2xf32> to vector<2x1xf32>
    %cst_75 = arith.constant 3.200000e+01 : f32
    %250 = vector.broadcast %cst_75 : f32 to vector<2x1xf32>
    %251 = arith.divf %249, %250 : vector<2x1xf32>
    %252 = vector.broadcast %251 : vector<2x1xf32> to vector<2x32xf32>
    %253 = arith.subf %247, %252 : vector<2x32xf32>
    %254 = arith.mulf %253, %253 : vector<2x32xf32>
    %cst_76 = arith.constant dense<0.000000e+00> : vector<2xf32>
    %255 = vector.multi_reduction <add>, %254, %cst_76 [1] : vector<2x32xf32> to vector<2xf32>
    %256 = vector.shape_cast %255 : vector<2xf32> to vector<2x1xf32>
    %cst_77 = arith.constant 3.200000e+01 : f32
    %257 = vector.broadcast %cst_77 : f32 to vector<2x1xf32>
    %258 = arith.divf %256, %257 : vector<2x1xf32>
    %cst_78 = arith.constant 9.99999974E-6 : f32
    %259 = vector.broadcast %cst_78 : f32 to vector<2x1xf32>
    %260 = arith.addf %258, %259 : vector<2x1xf32>
    %261 = math.rsqrt %260 : vector<2x1xf32>
    %262 = vector.broadcast %261 : vector<2x1xf32> to vector<2x32xf32>
    %263 = arith.mulf %253, %262 : vector<2x32xf32>
    %264 = vector.broadcast %3 : vector<1x32xf32> to vector<2x32xf32>
    %265 = arith.mulf %263, %264 : vector<2x32xf32>
    %266 = vector.broadcast %4 : vector<1x32xf32> to vector<2x32xf32>
    %267 = arith.addf %265, %266 : vector<2x32xf32>
    %c0_79 = arith.constant 0 : index
    %c352 = arith.constant 352 : index
    %268 = vector.load %arg5[%c0_79, %c352] : memref<2x512xf32, #tpu.memory_space<vmem>>, vector<2x32xf32>
    tpu.vector_store %arg5[%c0_79, %c352], %267 {strides = array<i32>} : memref<2x512xf32, #tpu.memory_space<vmem>>, vector<2x32xf32>,
    %269 = vector.extract_strided_slice %2 {offsets = [0, 384], sizes = [2, 32], strides = [1, 1]} : vector<2x512xf32> to vector<2x32xf32>
    %cst_80 = arith.constant dense<0.000000e+00> : vector<2xf32>
    %270 = vector.multi_reduction <add>, %269, %cst_80 [1] : vector<2x32xf32> to vector<2xf32>
    %271 = vector.shape_cast %270 : vector<2xf32> to vector<2x1xf32>
    %cst_81 = arith.constant 3.200000e+01 : f32
    %272 = vector.broadcast %cst_81 : f32 to vector<2x1xf32>
    %273 = arith.divf %271, %272 : vector<2x1xf32>
    %274 = vector.broadcast %273 : vector<2x1xf32> to vector<2x32xf32>
    %275 = arith.subf %269, %274 : vector<2x32xf32>
    %276 = arith.mulf %275, %275 : vector<2x32xf32>
    %cst_82 = arith.constant dense<0.000000e+00> : vector<2xf32>
    %277 = vector.multi_reduction <add>, %276, %cst_82 [1] : vector<2x32xf32> to vector<2xf32>
    %278 = vector.shape_cast %277 : vector<2xf32> to vector<2x1xf32>
    %cst_83 = arith.constant 3.200000e+01 : f32
    %279 = vector.broadcast %cst_83 : f32 to vector<2x1xf32>
    %280 = arith.divf %278, %279 : vector<2x1xf32>
    %cst_84 = arith.constant 9.99999974E-6 : f32
    %281 = vector.broadcast %cst_84 : f32 to vector<2x1xf32>
    %282 = arith.addf %280, %281 : vector<2x1xf32>
    %283 = math.rsqrt %282 : vector<2x1xf32>
    %284 = vector.broadcast %283 : vector<2x1xf32> to vector<2x32xf32>
    %285 = arith.mulf %275, %284 : vector<2x32xf32>
    %286 = vector.broadcast %3 : vector<1x32xf32> to vector<2x32xf32>
    %287 = arith.mulf %285, %286 : vector<2x32xf32>
    %288 = vector.broadcast %4 : vector<1x32xf32> to vector<2x32xf32>
    %289 = arith.addf %287, %288 : vector<2x32xf32>
    %c0_85 = arith.constant 0 : index
    %c384 = arith.constant 384 : index
    %290 = vector.load %arg5[%c0_85, %c384] : memref<2x512xf32, #tpu.memory_space<vmem>>, vector<2x32xf32>
    tpu.vector_store %arg5[%c0_85, %c384], %289 {strides = array<i32>} : memref<2x512xf32, #tpu.memory_space<vmem>>, vector<2x32xf32>,
    %291 = vector.extract_strided_slice %2 {offsets = [0, 416], sizes = [2, 32], strides = [1, 1]} : vector<2x512xf32> to vector<2x32xf32>
    %cst_86 = arith.constant dense<0.000000e+00> : vector<2xf32>
    %292 = vector.multi_reduction <add>, %291, %cst_86 [1] : vector<2x32xf32> to vector<2xf32>
    %293 = vector.shape_cast %292 : vector<2xf32> to vector<2x1xf32>
    %cst_87 = arith.constant 3.200000e+01 : f32
    %294 = vector.broadcast %cst_87 : f32 to vector<2x1xf32>
    %295 = arith.divf %293, %294 : vector<2x1xf32>
    %296 = vector.broadcast %295 : vector<2x1xf32> to vector<2x32xf32>
    %297 = arith.subf %291, %296 : vector<2x32xf32>
    %298 = arith.mulf %297, %297 : vector<2x32xf32>
    %cst_88 = arith.constant dense<0.000000e+00> : vector<2xf32>
    %299 = vector.multi_reduction <add>, %298, %cst_88 [1] : vector<2x32xf32> to vector<2xf32>
    %300 = vector.shape_cast %299 : vector<2xf32> to vector<2x1xf32>
    %cst_89 = arith.constant 3.200000e+01 : f32
    %301 = vector.broadcast %cst_89 : f32 to vector<2x1xf32>
    %302 = arith.divf %300, %301 : vector<2x1xf32>
    %cst_90 = arith.constant 9.99999974E-6 : f32
    %303 = vector.broadcast %cst_90 : f32 to vector<2x1xf32>
    %304 = arith.addf %302, %303 : vector<2x1xf32>
    %305 = math.rsqrt %304 : vector<2x1xf32>
    %306 = vector.broadcast %305 : vector<2x1xf32> to vector<2x32xf32>
    %307 = arith.mulf %297, %306 : vector<2x32xf32>
    %308 = vector.broadcast %3 : vector<1x32xf32> to vector<2x32xf32>
    %309 = arith.mulf %307, %308 : vector<2x32xf32>
    %310 = vector.broadcast %4 : vector<1x32xf32> to vector<2x32xf32>
    %311 = arith.addf %309, %310 : vector<2x32xf32>
    %c0_91 = arith.constant 0 : index
    %c416 = arith.constant 416 : index
    %312 = vector.load %arg5[%c0_91, %c416] : memref<2x512xf32, #tpu.memory_space<vmem>>, vector<2x32xf32>
    tpu.vector_store %arg5[%c0_91, %c416], %311 {strides = array<i32>} : memref<2x512xf32, #tpu.memory_space<vmem>>, vector<2x32xf32>,
    %313 = vector.extract_strided_slice %2 {offsets = [0, 448], sizes = [2, 32], strides = [1, 1]} : vector<2x512xf32> to vector<2x32xf32>
    %cst_92 = arith.constant dense<0.000000e+00> : vector<2xf32>
    %314 = vector.multi_reduction <add>, %313, %cst_92 [1] : vector<2x32xf32> to vector<2xf32>
    %315 = vector.shape_cast %314 : vector<2xf32> to vector<2x1xf32>
    %cst_93 = arith.constant 3.200000e+01 : f32
    %316 = vector.broadcast %cst_93 : f32 to vector<2x1xf32>
    %317 = arith.divf %315, %316 : vector<2x1xf32>
    %318 = vector.broadcast %317 : vector<2x1xf32> to vector<2x32xf32>
    %319 = arith.subf %313, %318 : vector<2x32xf32>
    %320 = arith.mulf %319, %319 : vector<2x32xf32>
    %cst_94 = arith.constant dense<0.000000e+00> : vector<2xf32>
    %321 = vector.multi_reduction <add>, %320, %cst_94 [1] : vector<2x32xf32> to vector<2xf32>
    %322 = vector.shape_cast %321 : vector<2xf32> to vector<2x1xf32>
    %cst_95 = arith.constant 3.200000e+01 : f32
    %323 = vector.broadcast %cst_95 : f32 to vector<2x1xf32>
    %324 = arith.divf %322, %323 : vector<2x1xf32>
    %cst_96 = arith.constant 9.99999974E-6 : f32
    %325 = vector.broadcast %cst_96 : f32 to vector<2x1xf32>
    %326 = arith.addf %324, %325 : vector<2x1xf32>
    %327 = math.rsqrt %326 : vector<2x1xf32>
    %328 = vector.broadcast %327 : vector<2x1xf32> to vector<2x32xf32>
    %329 = arith.mulf %319, %328 : vector<2x32xf32>
    %330 = vector.broadcast %3 : vector<1x32xf32> to vector<2x32xf32>
    %331 = arith.mulf %329, %330 : vector<2x32xf32>
    %332 = vector.broadcast %4 : vector<1x32xf32> to vector<2x32xf32>
    %333 = arith.addf %331, %332 : vector<2x32xf32>
    %c0_97 = arith.constant 0 : index
    %c448 = arith.constant 448 : index
    %334 = vector.load %arg5[%c0_97, %c448] : memref<2x512xf32, #tpu.memory_space<vmem>>, vector<2x32xf32>
    tpu.vector_store %arg5[%c0_97, %c448], %333 {strides = array<i32>} : memref<2x512xf32, #tpu.memory_space<vmem>>, vector<2x32xf32>,
    %335 = vector.extract_strided_slice %2 {offsets = [0, 480], sizes = [2, 32], strides = [1, 1]} : vector<2x512xf32> to vector<2x32xf32>
    %cst_98 = arith.constant dense<0.000000e+00> : vector<2xf32>
    %336 = vector.multi_reduction <add>, %335, %cst_98 [1] : vector<2x32xf32> to vector<2xf32>
    %337 = vector.shape_cast %336 : vector<2xf32> to vector<2x1xf32>
    %cst_99 = arith.constant 3.200000e+01 : f32
    %338 = vector.broadcast %cst_99 : f32 to vector<2x1xf32>
    %339 = arith.divf %337, %338 : vector<2x1xf32>
    %340 = vector.broadcast %339 : vector<2x1xf32> to vector<2x32xf32>
    %341 = arith.subf %335, %340 : vector<2x32xf32>
    %342 = arith.mulf %341, %341 : vector<2x32xf32>
    %cst_100 = arith.constant dense<0.000000e+00> : vector<2xf32>
    %343 = vector.multi_reduction <add>, %342, %cst_100 [1] : vector<2x32xf32> to vector<2xf32>
    %344 = vector.shape_cast %343 : vector<2xf32> to vector<2x1xf32>
    %cst_101 = arith.constant 3.200000e+01 : f32
    %345 = vector.broadcast %cst_101 : f32 to vector<2x1xf32>
    %346 = arith.divf %344, %345 : vector<2x1xf32>
    %cst_102 = arith.constant 9.99999974E-6 : f32
    %347 = vector.broadcast %cst_102 : f32 to vector<2x1xf32>
    %348 = arith.addf %346, %347 : vector<2x1xf32>
    %349 = math.rsqrt %348 : vector<2x1xf32>
    %350 = vector.broadcast %349 : vector<2x1xf32> to vector<2x32xf32>
    %351 = arith.mulf %341, %350 : vector<2x32xf32>
    %352 = vector.broadcast %3 : vector<1x32xf32> to vector<2x32xf32>
    %353 = arith.mulf %351, %352 : vector<2x32xf32>
    %354 = vector.broadcast %4 : vector<1x32xf32> to vector<2x32xf32>
    %355 = arith.addf %353, %354 : vector<2x32xf32>
    %c0_103 = arith.constant 0 : index
    %c480 = arith.constant 480 : index
    %356 = vector.load %arg5[%c0_103, %c480] : memref<2x512xf32, #tpu.memory_space<vmem>>, vector<2x32xf32>
    tpu.vector_store %arg5[%c0_103, %c480], %355 {strides = array<i32>} : memref<2x512xf32, #tpu.memory_space<vmem>>, vector<2x32xf32>,
    return
  }
  func.func @transform_0(%arg0: i32) -> (i32, i32) {
    %c0_i32 = arith.constant 0 : i32
    %c0_i32_0 = arith.constant 0 : i32
    %c0_i32_1 = arith.constant 0 : i32
    return %c0_i32, %c0_i32_0 : i32, i32
  }
  func.func @transform_1(%arg0: i32) -> (i32, i32) {
    %c0_i32 = arith.constant 0 : i32
    %c0_i32_0 = arith.constant 0 : i32
    %c0_i32_1 = arith.constant 0 : i32
    return %c0_i32, %c0_i32_0 : i32, i32
  }
  func.func @transform_2(%arg0: i32) -> (i32, i32) {
    %c0_i32 = arith.constant 0 : i32
    %c0_i32_0 = arith.constant 0 : i32
    %c0_i32_1 = arith.constant 0 : i32
    return %c0_i32, %c0_i32_0 : i32, i32
  }
  func.func @transform_3(%arg0: i32) -> (i32, i32) {
    %c0_i32 = arith.constant 0 : i32
    %c0_i32_0 = arith.constant 0 : i32
    %c0_i32_1 = arith.constant 0 : i32
    return %c0_i32, %c0_i32_0 : i32, i32
  }
  func.func @transform_4(%arg0: i32) -> (i32, i32) {
    %c0_i32 = arith.constant 0 : i32
    %c0_i32_0 = arith.constant 0 : i32
    %c0_i32_1 = arith.constant 0 : i32
    return %c0_i32, %c0_i32_0 : i32, i32
  }
}

</mosaic_0001>

<bundles_post_ra>
// kernel: tpu_custom_call.1
= control target key start
LH: loop header
LB: loop body
LE: loop exit
PB: predicated region body
PF: predicated region fallthrough
CT: control target
= control target key end

     0   :  { %9 = vsyncpa [#allocation3], 0  ;;  %s1060_s0 = inlined_call_operand.hbm [shape: f32[2,128], index: 0, kind: input, shape index: {}]   ;;  %s1061_s1 = inlined_call_operand.hbm [shape: f32[128,512], index: 1, kind: input, shape index: {}]   ;;  %s1062_s2 = inlined_call_operand.vmem [shape: f32[1,32], index: 2, kind: input, shape index: {}]   ;;  %s1063_s3 = inlined_call_operand.vmem [shape: f32[1,32], index: 3, kind: input, shape index: {}]   ;;  %s1064_s4 = inlined_call_operand.hbm [shape: f32[2,512], index: 4, kind: output, shape index: {}]  }
   0x1   :  { %10 = vsyncpa [#allocation6], 0 }
   0x2   :  { %11 = vsyncpa [#allocation4], 0  ;;  %s756_s15 = smov [#allocation2]   ;;  %s757_s17 = smov [#allocation5]  }
   0x3   :  { %s18_s16 = sshll.u32 %s756_s15, 4  ;;  %s27_s18 = sshll.u32 %s757_s17, 4  ;;  %s19_s16 = int_to_ptr.vmem [resolvable:$true] %s18_s16  ;;  %s28_s18 = int_to_ptr.vmem [resolvable:$true] %s27_s18 }
   0x4   :  { %s698_s19 = scalar_lea.vmem %s19_s16, 32  ;;  %p703_p1 = scmp.lt.s32.totalorder %s19_s16, %s19_s16 }
   0x5   :  { %p699_p0 = scmp.ne.s32.totalorder %s19_s16, %s698_s19  ;;  %p704_p2 = scmp.lt.s32.totalorder %s698_s19, %s698_s19 }
   0x7   :  { %p705_p3 = por %p704_p2, %p703_p1 }
   0x9   :  { %p706_p4 = pnand %p705_p3, %p699_p0 }
   0xb   :  { %709 = shalt.err (!%p706_p4)
}
   0xc   :  { %21 = dma.hbm_to_vmem [thread:$0]  %s1060_s0, 32, %s19_s16, [#allocation3]  }
   0xd   :  { %s718_s22 = scalar_lea.vmem %s28_s18, 8192  ;;  %p723_p6 = scmp.lt.s32.totalorder %s28_s18, %s28_s18 }
   0xe   :  { %p719_p5 = scmp.ne.s32.totalorder %s28_s18, %s718_s22  ;;  %p724_p7 = scmp.lt.s32.totalorder %s718_s22, %s718_s22 }
  0x10   :  { %p725_p8 = por %p724_p7, %p723_p6 }
  0x12   :  { %p726_p9 = pnand %p725_p8, %p719_p5 }
  0x14   :  { %729 = shalt.err (!%p726_p9)
}
  0x15   :  { %s758_s23 = smov 512   ;;  %s759_s24 = smov 32  }
  0x16   :  { %33 = dma.hbm_to_vmem [thread:$0]  %s1061_s1, 8192, %s28_s18, [#allocation6], %s758_s23, %s758_s23, %s759_s24  }
  0x17   :  { %750 = dma.done.wait [#allocation3], 32  }
  0x18   :  { %751 = vsyncadd [#allocation3], 4294967264 }
  0x19   :  { %752 = dma.done.wait [#allocation6], 8192  }
  0x1a   :  { %753 = vsyncadd [#allocation6], 4294959104  ;;  %v760_v0 = vmov 0.0   ;;  %v106_v1 = vld [vmem:[#allocation5 + $0x1e8] sm:$0xff]  ;;  %v105_v2 = vld [vmem:[#allocation5 + $0x1e0] sm:$0xff]  ;;  %s761_s29 = smov 64  }
  0x1b   :  { %173 = vmatprep.mubr.f32.mxu0 %v760_v0  ;;  %244 = vmatprep.mubr.f32.mxu1 %v760_v0  ;;  %v102_v3 = vld [vmem:[#allocation5 + $0x1c8] sm:$0xff]  ;;  %v101_v4 = vld [vmem:[#allocation5 + $0x1c0] sm:$0xff]  ;;  %v108_v5 = vld [vmem:[#allocation5 + $0x1f8] sm:$0xff]  ;;  %vm253_vm0 = vcmask 254976   ;;  %vm312_vm1 = vcmask 517376   ;;  %vm342_vm2 = vcmask 779776  }
  0x1c   :  { %109 = vmatprep.subr.mxu0 %v106_v1  ;;  %v98_v6 = vld [vmem:[#allocation5 + $0x1a8] sm:$0xff]  ;;  %180 = vmatprep.subr.mxu1 %v108_v5  ;;  %v107_v7 = vld [vmem:[#allocation5 + $0x1f0] sm:$0xff]  ;;  %v97_v8 = vld [vmem:[#allocation5 + $0x1a0] sm:$0xff]  ;;  %vm372_vm3 = vcmask 1042176  }
  0x1d   :  { %110 = vmatpush1.msra.mxu0 %v105_v2  ;;  %181 = vmatpush1.msra.mxu1 %v107_v7  ;;  %v104_v9 = vld [vmem:[#allocation5 + $0x1d8] sm:$0xff]  ;;  %v103_v10 = vld [vmem:[#allocation5 + $0x1d0] sm:$0xff]  ;;  %v94_v11 = vld [vmem:[#allocation5 + $0x188] sm:$0xff] }
  0x1e   :  { %111 = vmatprep.subr.mxu0 %v102_v3  ;;  %182 = vmatprep.subr.mxu1 %v104_v9  ;;  %v100_v12 = vld [vmem:[#allocation5 + $0x1b8] sm:$0xff]  ;;  %v93_v13 = vld [vmem:[#allocation5 + $0x180] sm:$0xff]  ;;  %v99_v14 = vld [vmem:[#allocation5 + $0x1b0] sm:$0xff] }
  0x1f   :  { %112 = vmatpush1.msra.mxu0 %v101_v4  ;;  %183 = vmatpush1.msra.mxu1 %v103_v10  ;;  %v96_v15 = vld [vmem:[#allocation5 + $0x198] sm:$0xff]  ;;  %v90_v16 = vld [vmem:[#allocation5 + $0x168] sm:$0xff]  ;;  %v95_v17 = vld [vmem:[#allocation5 + $0x190] sm:$0xff] }
  0x20   :  { %113 = vmatprep.subr.mxu0 %v98_v6  ;;  %184 = vmatprep.subr.mxu1 %v100_v12  ;;  %v89_v18 = vld [vmem:[#allocation5 + $0x160] sm:$0xff]  ;;  %v92_v19 = vld [vmem:[#allocation5 + $0x178] sm:$0xff]  ;;  %v86_v20 = vld [vmem:[#allocation5 + $0x148] sm:$0xff] }
  0x21   :  { %114 = vmatpush1.msra.mxu0 %v97_v8  ;;  %185 = vmatpush1.msra.mxu1 %v99_v14  ;;  %v91_v21 = vld [vmem:[#allocation5 + $0x170] sm:$0xff]  ;;  %v85_v22 = vld [vmem:[#allocation5 + $0x140] sm:$0xff]  ;;  %v88_v23 = vld [vmem:[#allocation5 + $0x158] sm:$0xff] }
  0x22   :  { %115 = vmatprep.subr.mxu0 %v94_v11  ;;  %186 = vmatprep.subr.mxu1 %v96_v15  ;;  %v82_v24 = vld [vmem:[#allocation5 + $0x128] sm:$0xff]  ;;  %v87_v25 = vld [vmem:[#allocation5 + $0x150] sm:$0xff]  ;;  %v81_v26 = vld [vmem:[#allocation5 + $0x120] sm:$0xff] }
  0x23   :  { %116 = vmatpush1.msra.mxu0 %v93_v13  ;;  %187 = vmatpush1.msra.mxu1 %v95_v17  ;;  %v84_v27 = vld [vmem:[#allocation5 + $0x138] sm:$0xff]  ;;  %v78_v28 = vld [vmem:[#allocation5 + $0x108] sm:$0xff]  ;;  %v83_v29 = vld [vmem:[#allocation5 + $0x130] sm:$0xff] }
  0x24   :  { %117 = vmatprep.subr.mxu0 %v90_v16  ;;  %188 = vmatprep.subr.mxu1 %v92_v19  ;;  %v77_v30 = vld [vmem:[#allocation5 + $0x100] sm:$0xff]  ;;  %v80_v31 = vld [vmem:[#allocation5 + $0x118] sm:$0xff]  ;;  %v74_v32 = vld [vmem:[#allocation5 + $0xe8] sm:$0xff] }
  0x25   :  { %118 = vmatpush1.msra.mxu0 %v89_v18  ;;  %189 = vmatpush1.msra.mxu1 %v91_v21  ;;  %v79_v33 = vld [vmem:[#allocation5 + $0x110] sm:$0xff]  ;;  %v73_v34 = vld [vmem:[#allocation5 + $0xe0] sm:$0xff]  ;;  %v76_v35 = vld [vmem:[#allocation5 + $0xf8] sm:$0xff] }
  0x26   :  { %119 = vmatprep.subr.mxu0 %v86_v20  ;;  %190 = vmatprep.subr.mxu1 %v88_v23  ;;  %v70_v36 = vld [vmem:[#allocation5 + $0xc8] sm:$0xff]  ;;  %v75_v37 = vld [vmem:[#allocation5 + $0xf0] sm:$0xff]  ;;  %v69_v38 = vld [vmem:[#allocation5 + $0xc0] sm:$0xff] }
  0x27   :  { %120 = vmatpush1.msra.mxu0 %v85_v22  ;;  %191 = vmatpush1.msra.mxu1 %v87_v25  ;;  %v72_v39 = vld [vmem:[#allocation5 + $0xd8] sm:$0xff]  ;;  %v66_v40 = vld [vmem:[#allocation5 + $0xa8] sm:$0xff]  ;;  %v71_v41 = vld [vmem:[#allocation5 + $0xd0] sm:$0xff] }
  0x28   :  { %121 = vmatprep.subr.mxu0 %v82_v24  ;;  %192 = vmatprep.subr.mxu1 %v84_v27  ;;  %v65_v42 = vld [vmem:[#allocation5 + $0xa0] sm:$0xff]  ;;  %v68_v43 = vld [vmem:[#allocation5 + $0xb8] sm:$0xff]  ;;  %v62_v44 = vld [vmem:[#allocation5 + $0x88] sm:$0xff] }
  0x29   :  { %122 = vmatpush1.msra.mxu0 %v81_v26  ;;  %193 = vmatpush1.msra.mxu1 %v83_v29  ;;  %v67_v45 = vld [vmem:[#allocation5 + $0xb0] sm:$0xff]  ;;  %v61_v46 = vld [vmem:[#allocation5 + $0x80] sm:$0xff]  ;;  %v64_v47 = vld [vmem:[#allocation5 + $0x98] sm:$0xff] }
  0x2a   :  { %123 = vmatprep.subr.mxu0 %v78_v28  ;;  %194 = vmatprep.subr.mxu1 %v80_v31  ;;  %v58_v48 = vld [vmem:[#allocation5 + $0x68] sm:$0xff]  ;;  %v63_v49 = vld [vmem:[#allocation5 + $0x90] sm:$0xff]  ;;  %v57_v50 = vld [vmem:[#allocation5 + $0x60] sm:$0xff] }
  0x2b   :  { %124 = vmatpush1.msra.mxu0 %v77_v30  ;;  %195 = vmatpush1.msra.mxu1 %v79_v33  ;;  %v60_v51 = vld [vmem:[#allocation5 + $0x78] sm:$0xff]  ;;  %v54_v52 = vld [vmem:[#allocation5 + $0x48] sm:$0xff]  ;;  %v59_v53 = vld [vmem:[#allocation5 + $0x70] sm:$0xff] }
  0x2c   :  { %125 = vmatprep.subr.mxu0 %v74_v32  ;;  %196 = vmatprep.subr.mxu1 %v76_v35  ;;  %v53_v54 = vld [vmem:[#allocation5 + $0x40] sm:$0xff]  ;;  %v56_v55 = vld [vmem:[#allocation5 + $0x58] sm:$0xff]  ;;  %v50_v56 = vld [vmem:[#allocation5 + $0x28] sm:$0xff] }
  0x2d   :  { %126 = vmatpush1.msra.mxu0 %v73_v34  ;;  %197 = vmatpush1.msra.mxu1 %v75_v37  ;;  %v55_v57 = vld [vmem:[#allocation5 + $0x50] sm:$0xff]  ;;  %v49_v58 = vld [vmem:[#allocation5 + $0x20] sm:$0xff]  ;;  %v52_v59 = vld [vmem:[#allocation5 + $0x38] sm:$0xff] }
  0x2e   :  { %127 = vmatprep.subr.mxu0 %v70_v36  ;;  %198 = vmatprep.subr.mxu1 %v72_v39  ;;  %v46_v60 = vld [vmem:[#allocation5 + $0x8] sm:$0xff]  ;;  %v51_v61 = vld [vmem:[#allocation5 + $0x30] sm:$0xff]  ;;  %v45_v62 = vld [vmem:[#allocation5] sm:$0xff] }
  0x2f   :  { %128 = vmatpush1.msra.mxu0 %v69_v38  ;;  %199 = vmatpush1.msra.mxu1 %v71_v41  ;;  %v48_v63 = vld [vmem:[#allocation5 + $0x18] sm:$0xff]  ;;  %v47_v1 = vld [vmem:[#allocation5 + $0x10] sm:$0xff] }
  0x30   :  { %129 = vmatprep.subr.mxu0 %v66_v40  ;;  %200 = vmatprep.subr.mxu1 %v68_v43  ;;  %v44_v0 = vld [vmem:[#allocation2] sm:$0x3] }
  0x31   :  { %130 = vmatpush1.msra.mxu0 %v65_v42  ;;  %201 = vmatpush1.msra.mxu1 %v67_v45  ;;  %v799_v2 = vld [vmem:[%s1062_s2] ss:$0 sm:$0xff]  ;;  %s762_s2 = smov 96  }
  0x32   :  { %131 = vmatprep.subr.mxu0 %v62_v44  ;;  %202 = vmatprep.subr.mxu1 %v64_v47  ;;  %v806_v3 = vld [vmem:[%s1063_s3] ss:$0 sm:$0xff]  ;;  %s763_s3 = smov [#allocation7]  }
  0x33   :  { %132 = vmatpush1.msra.mxu0 %v61_v46  ;;  %203 = vmatpush1.msra.mxu1 %v63_v49  ;;  %s638_s30 = sshll.u32 %s763_s3, 4  ;;  %s639_s30 = int_to_ptr.vmem [resolvable:$true] %s638_s30 }
  0x34   :  { %133 = vmatprep.subr.mxu0 %v58_v48  ;;  %204 = vmatprep.subr.mxu1 %v60_v51  ;;  %s730_s5 = scalar_lea.vmem %s639_s30, 128  ;;  %p735_p11 = scmp.lt.s32.totalorder %s639_s30, %s639_s30 }
  0x35   :  { %134 = vmatpush1.msra.mxu0 %v57_v50  ;;  %205 = vmatpush1.msra.mxu1 %v59_v53  ;;  %p731_p10 = scmp.ne.s32.totalorder %s639_s30, %s730_s5  ;;  %p736_p12 = scmp.lt.s32.totalorder %s730_s5, %s730_s5 }
  0x36   :  { %135 = vmatprep.subr.mxu0 %v54_v52  ;;  %206 = vmatprep.subr.mxu1 %v56_v55 }
  0x37   :  { %136 = vmatpush1.msra.mxu0 %v53_v54  ;;  %207 = vmatpush1.msra.mxu1 %v55_v57  ;;  %p737_p13 = por %p736_p12, %p735_p11 }
  0x38   :  { %137 = vmatprep.subr.mxu0 %v50_v56  ;;  %208 = vmatprep.subr.mxu1 %v52_v59 }
  0x39   :  { %138 = vmatpush1.msra.mxu0 %v49_v58  ;;  %209 = vmatpush1.msra.mxu1 %v51_v61  ;;  %p738_p0 = pnand %p737_p13, %p731_p10 }
  0x3a   :  { %139 = vmatprep.subr.mxu0 %v46_v60  ;;  %210 = vmatprep.subr.mxu1 %v48_v63 }
  0x3b   :  { %140 = vmatpush1.msra.mxu0 %v45_v62  ;;  %211 = vmatpush1.msra.mxu1 %v47_v1 }
  0x3c   :  { %174 = vmatmul.mubr.f32.vlgmr.msra.gmra.mxu0 %v44_v0  ;;  %245 = vmatmul.mubr.f32.vlgmr.msra.gmra.mxu1 %v44_v0 }
  0x3d   :  { %304 = vrot.lane.b32.xlu1 %v799_v2, %s759_s24 }
  0x41   :  { %308 = vrot.lane.b32.xlu1 %v806_v3, %s759_s24 }
  0x45   :  { %334 = vrot.lane.b32.xlu1 %v799_v2, %s761_s29 }
  0x49   :  { %338 = vrot.lane.b32.xlu1 %v806_v3, %s761_s29 }
  0x4d   :  { %364 = vrot.lane.b32.xlu1 %v799_v2, %s762_s2 }
  0x51   :  { %368 = vrot.lane.b32.xlu1 %v806_v3, %s762_s2 }
  0xaf   :  { %v854_v10 = vpop.permute.xlu1 %304 }
  0xb3   :  { %v856_v11 = vpop.permute.xlu1 %308 }
  0xb7   :  { %v858_v12 = vpop.permute.xlu1 %334 }
  0xbb   :  { %v860_v13 = vpop.permute.xlu1 %338 }
  0xbf   :  { %v862_v14 = vpop.permute.xlu1 %364 }
  0xc3   :  { %v866_v16 = vpop.permute.xlu1 %368 }
  0xfc   :  { %v818_v4 = vpop.f32.mrf.mxu0  ;;  %v824_v5 = vpop.f32.mrf.mxu1 }
  0xfd   :  { %314 = vrot.lane.b32.xlu0 %v818_v4, %s761_s29  ;;  %284 = vrot.lane.b32.xlu1 %v818_v4, %s762_s2  ;;  %v254_v7 = vsel %vm253_vm0, %v818_v4, 0.0  ;;  %v460_v8 = vsel %vm253_vm0, %v824_v5, 0.0 }
  0xfe   :  { %v830_v6 = vpop.f32.mrf.mxu1  ;;  %v844_v9 = vpop.f32.mrf.mxu0 }
  0xff   :  { %v374_v15 = vsel %vm253_vm0, %v844_v9, 0.0  ;;  %v546_v47 = vsel %vm253_vm0, %v830_v6, 0.0 }
 0x101   :  { %344 = vrot.lane.b32.xlu0 %v818_v4, %s759_s24  ;;  %500 = vrot.lane.b32.xlu1 %v824_v5, %s761_s29 }
 0x105   :  { %477 = vrot.lane.b32.xlu0 %v824_v5, %s762_s2  ;;  %563 = vrot.lane.b32.xlu1 %v830_v6, %s762_s2 }
 0x109   :  { %586 = vrot.lane.b32.xlu1 %v830_v6, %s761_s29 }
 0x10d   :  { %609 = vrot.lane.b32.xlu1 %v830_v6, %s759_s24 }
 0x124   :  { %255 = vadd.xlane.f32.xlu0 %v254_v7 }
 0x128   :  { %461 = vadd.xlane.f32.xlu0 %v460_v8 }
 0x13e   :  { %391 = vrot.lane.b32.xlu0 %v844_v9, %s762_s2 }
 0x142   :  { %414 = vrot.lane.b32.xlu0 %v844_v9, %s761_s29 }
 0x146   :  { %437 = vrot.lane.b32.xlu0 %v844_v9, %s759_s24 }
 0x14a   :  { %523 = vrot.lane.b32.xlu0 %v824_v5, %s759_s24 }
 0x169   :  { %375 = vadd.xlane.f32.xlu0 %v374_v15 }
 0x16f   :  { %v315_v17 = vpop.permute.xlu0 %314  ;;  %v285_v18 = vpop.permute.xlu1 %284 }
 0x170   :  { %v287_v19 = vsel %vm253_vm0, %v285_v18, 0.0  ;;  %v317_v22 = vsel %vm253_vm0, %v315_v17, 0.0 }
 0x171   :  { %288 = vadd.xlane.f32.xlu1 %v287_v19 }
 0x173   :  { %v345_v20 = vpop.permute.xlu0 %344  ;;  %v501_v21 = vpop.permute.xlu1 %500 }
 0x174   :  { %v347_v25 = vsel %vm253_vm0, %v345_v20, 0.0  ;;  %v503_v29 = vsel %vm253_vm0, %v501_v21, 0.0 }
 0x175   :  { %318 = vadd.xlane.f32.xlu1 %v317_v22 }
 0x177   :  { %v478_v23 = vpop.permute.xlu0 %477  ;;  %v564_v24 = vpop.permute.xlu1 %563 }
 0x178   :  { %v480_v26 = vsel %vm253_vm0, %v478_v23, 0.0  ;;  %v566_v41 = vsel %vm253_vm0, %v564_v24, 0.0 }
 0x179   :  { %348 = vadd.xlane.f32.xlu1 %v347_v25  ;;  %481 = vadd.xlane.f32.xlu0 %v480_v26 }
 0x17b   :  { %v587_v27 = vpop.permute.xlu1 %586 }
 0x17c   :  { %v589_v28 = vsel %vm253_vm0, %v587_v27, 0.0 }
 0x17d   :  { %590 = vadd.xlane.f32.xlu1 %v589_v28  ;;  %504 = vadd.xlane.f32.xlu0 %v503_v29 }
 0x17f   :  { %v610_v42 = vpop.permute.xlu1 %609 }
 0x180   :  { %v612_v45 = vsel %vm253_vm0, %v610_v42, 0.0 }
 0x1ad   :  { %v256_v30 = vpop.xlane.xlu0 %255 }
 0x1ae   :  { %v258_v40 = vmul.f32 0.03125, %v256_v30 }
 0x1b0   :  { %v880_v43 = vsub.f32 %v818_v4, %v258_v40 }
 0x1b1   :  { %v462_v31 = vpop.xlane.xlu0 %461 }
 0x1b2   :  { %v463_v44 = vmul.f32 0.03125, %v462_v31  ;;  %v260_v48 = vmul.f32 %v880_v43, %v880_v43 }
 0x1b4   :  { %v884_v46 = vsub.f32 %v824_v5, %v463_v44  ;;  %v261_v49 = vsel %vm253_vm0, %v260_v48, 0.0 }
 0x1b5   :  { %v392_v32 = vpop.permute.xlu0 %391 }
 0x1b6   :  { %v394_v37 = vsel %vm253_vm0, %v392_v32, 0.0  ;;  %v465_v50 = vmul.f32 %v884_v46, %v884_v46 }
 0x1b8   :  { %v466_v51 = vsel %vm253_vm0, %v465_v50, 0.0 }
 0x1b9   :  { %v415_v33 = vpop.permute.xlu0 %414 }
 0x1ba   :  { %v417_v38 = vsel %vm253_vm0, %v415_v33, 0.0 }
 0x1bd   :  { %v438_v34 = vpop.permute.xlu0 %437 }
 0x1be   :  { %v440_v39 = vsel %vm253_vm0, %v438_v34, 0.0 }
 0x1c1   :  { %v524_v35 = vpop.permute.xlu0 %523 }
 0x1c2   :  { %v526_v36 = vsel %vm253_vm0, %v524_v35, 0.0 }
 0x1c3   :  { %527 = vadd.xlane.f32.xlu0 %v526_v36 }
 0x1c7   :  { %395 = vadd.xlane.f32.xlu0 %v394_v37 }
 0x1cb   :  { %418 = vadd.xlane.f32.xlu0 %v417_v38 }
 0x1cf   :  { %441 = vadd.xlane.f32.xlu0 %v440_v39 }
 0x1d3   :  { %567 = vadd.xlane.f32.xlu0 %v566_v41 }
 0x1d7   :  { %613 = vadd.xlane.f32.xlu0 %v612_v45 }
 0x1db   :  { %547 = vadd.xlane.f32.xlu0 %v546_v47 }
 0x1df   :  { %262 = vadd.xlane.f32.xlu0 %v261_v49 }
 0x1e3   :  { %467 = vadd.xlane.f32.xlu0 %v466_v51 }
 0x1f2   :  { %v376_v52 = vpop.xlane.xlu0 %375 }
 0x1f3   :  { %v377_v53 = vmul.f32 0.03125, %v376_v52 }
 0x1f5   :  { %v895_v54 = vsub.f32 %v844_v9, %v377_v53 }
 0x1f7   :  { %v379_v55 = vmul.f32 %v895_v54, %v895_v54 }
 0x1f9   :  { %v380_v56 = vsel %vm253_vm0, %v379_v55, 0.0 }
 0x1fa   :  { %381 = vadd.xlane.f32.xlu1 %v380_v56  ;;  %v289_v1 = vpop.xlane.xlu1 %288 }
 0x1fb   :  { %v290_v49 = vmul.f32 0.03125, %v289_v1 }
 0x1fd   :  { %v952_v52 = vsub.f32 %v818_v4, %v290_v49 }
 0x1fe   :  { %v319_v7 = vpop.xlane.xlu1 %318 }
 0x1ff   :  { %v320_v53 = vmul.f32 0.03125, %v319_v7 }
 0x202   :  { %v482_v57 = vpop.xlane.xlu0 %481  ;;  %v349_v18 = vpop.xlane.xlu1 %348 }
 0x203   :  { %v483_v58 = vmul.f32 0.03125, %v482_v57 }
 0x205   :  { %v901_v59 = vsub.f32 %v824_v5, %v483_v58 }
 0x206   :  { %v505_v60 = vpop.xlane.xlu0 %504  ;;  %v591_v26 = vpop.xlane.xlu1 %590 }
 0x207   :  { %v506_v61 = vmul.f32 0.03125, %v505_v60  ;;  %v485_v63 = vmul.f32 %v901_v59, %v901_v59  ;;  %v592_v28 = vmul.f32 0.03125, %v591_v26  ;;  %v958_v60 = vsub.f32 %v818_v4, %v320_v53 }
 0x209   :  { %v904_v62 = vsub.f32 %v824_v5, %v506_v61  ;;  %v934_v33 = vsub.f32 %v830_v6, %v592_v28  ;;  %v350_v61 = vmul.f32 0.03125, %v349_v18 }
 0x20b   :  { %487 = vrot.lane.b32.xlu1 %v485_v63, %s762_s2  ;;  %v508_v0 = vmul.f32 %v904_v62, %v904_v62  ;;  %v594_v36 = vmul.f32 %v934_v33, %v934_v33  ;;  %v292_v63 = vmul.f32 %v952_v52, %v952_v52  ;;  %v967_v7 = vsub.f32 %v818_v4, %v350_v61 }
 0x20d   :  { %v352_v4 = vmul.f32 %v967_v7, %v967_v7 }
 0x20f   :  { %510 = vrot.lane.b32.xlu1 %v508_v0, %s761_s29 }
 0x24c   :  { %v528_v8 = vpop.xlane.xlu0 %527 }
 0x24d   :  { %v529_v15 = vmul.f32 0.03125, %v528_v8 }
 0x24f   :  { %v913_v17 = vsub.f32 %v824_v5, %v529_v15  ;;  %v322_v15 = vmul.f32 %v958_v60, %v958_v60 }
 0x250   :  { %v396_v19 = vpop.xlane.xlu0 %395 }
 0x251   :  { %v397_v20 = vmul.f32 0.03125, %v396_v19  ;;  %v531_v21 = vmul.f32 %v913_v17, %v913_v17 }
 0x253   :  { %v918_v22 = vsub.f32 %v844_v9, %v397_v20  ;;  %533 = vrot.lane.b32.xlu1 %v531_v21, %s759_s24 }
 0x254   :  { %v419_v23 = vpop.xlane.xlu0 %418 }
 0x255   :  { %v420_v24 = vmul.f32 0.03125, %v419_v23  ;;  %v399_v25 = vmul.f32 %v918_v22, %v918_v22 }
 0x257   :  { %v924_v5 = vsub.f32 %v844_v9, %v420_v24  ;;  %401 = vrot.lane.b32.xlu1 %v399_v25, %s762_s2 }
 0x258   :  { %v442_v27 = vpop.xlane.xlu0 %441 }
 0x259   :  { %v443_v29 = vmul.f32 0.03125, %v442_v27  ;;  %v422_v30 = vmul.f32 %v924_v5, %v924_v5 }
 0x25b   :  { %v930_v31 = vsub.f32 %v844_v9, %v443_v29  ;;  %424 = vrot.lane.b32.xlu1 %v422_v30, %s761_s29 }
 0x25c   :  { %v568_v32 = vpop.xlane.xlu0 %567 }
 0x25d   :  { %v445_v34 = vmul.f32 %v930_v31, %v930_v31 }
 0x25f   :  { %447 = vrot.lane.b32.xlu1 %v445_v34, %s759_s24 }
 0x260   :  { %v939_v35 = vpop.xlane.xlu0 %613 }
 0x263   :  { %596 = vrot.lane.b32.xlu1 %v594_v36, %s761_s29 }
 0x264   :  { %v548_v9 = vpop.xlane.xlu0 %547 }
 0x265   :  { %v549_v37 = vmul.f32 0.03125, %v548_v9 }
 0x267   :  { %v945_v38 = vsub.f32 %v830_v6, %v549_v37 }
 0x268   :  { %v263_v39 = vpop.xlane.xlu0 %262 }
 0x269   :  { %v264_v40 = vmul.f32 0.03125, %v263_v39  ;;  %v551_v41 = vmul.f32 %v945_v38, %v945_v38 }
 0x26b   :  { %v265_v42 = vadd.f32 1e-05, %v264_v40  ;;  %v552_v44 = vsel %vm253_vm0, %v551_v41, 0.0 }
 0x26c   :  { %553 = vadd.xlane.f32.xlu0 %v552_v44  ;;  %v468_v45 = vpop.xlane.xlu0 %467 }
 0x26d   :  { %658 = vrsqrt.f32 %v265_v42  ;;  %v469_v47 = vmul.f32 0.03125, %v468_v45 }
 0x26f   :  { %v470_v48 = vadd.f32 1e-05, %v469_v47 }
 0x271   :  { %660 = vrsqrt.f32 %v470_v48 }
 0x27a   :  { %v659_v50 = vpop.eup %658 }
 0x27b   :  { %v267_v51 = vmul.f32 %v659_v50, %v880_v43 }
 0x27d   :  { %v274_v55 = vmul.f32 %v799_v2, %v267_v51 }
 0x27e   :  { %v661_v56 = vpop.eup %660 }
 0x27f   :  { %v281_v57 = vadd.f32 %v806_v3, %v274_v55  ;;  %v472_v58 = vmul.f32 %v661_v56, %v884_v46  ;;  %v569_v46 = vmul.f32 0.03125, %v568_v32 }
 0x281   :  { %282 = vst.msk [vmem:[#allocation7] sm:$0x3] %vm253_vm0, %v281_v57  ;;  %v473_v43 = vmul.f32 %v799_v2, %v472_v58  ;;  %v974_v20 = vsub.f32 %v830_v6, %v569_v46 }
 0x282   :  { %294 = vrot.lane.b32.xlu0 %v292_v63, %s762_s2  ;;  %v615_v63 = vmul.f32 0.03125, %v939_v35 }
 0x283   :  { %v474_v0 = vadd.f32 %v806_v3, %v473_v43  ;;  %v382_v1 = vpop.xlane.xlu1 %381  ;;  %v571_v23 = vmul.f32 %v974_v20, %v974_v20 }
 0x284   :  { %v383_v8 = vmul.f32 0.03125, %v382_v1 }
 0x285   :  { %475 = vst.msk [vmem:[#allocation7 + $0x4] sm:$0x3] %vm253_vm0, %v474_v0  ;;  %v1003_v0 = vsub.f32 %v830_v6, %v615_v63 }
 0x286   :  { %v384_v18 = vadd.f32 1e-05, %v383_v8  ;;  %324 = vrot.lane.b32.xlu0 %v322_v15, %s761_s29 }
 0x287   :  { %v488_v19 = vpop.permute.xlu1 %487 }
 0x288   :  { %662 = vrsqrt.f32 %v384_v18  ;;  %v490_v21 = vsel %vm253_vm0, %v488_v19, 0.0 }
 0x289   :  { %491 = vadd.xlane.f32.xlu1 %v490_v21 }
 0x28a   :  { %354 = vrot.lane.b32.xlu0 %v352_v4, %s759_s24 }
 0x28b   :  { %v511_v28 = vpop.permute.xlu1 %510 }
 0x28c   :  { %v513_v50 = vsel %vm253_vm0, %v511_v28, 0.0 }
 0x28e   :  { %573 = vrot.lane.b32.xlu0 %v571_v23, %s762_s2 }
 0x295   :  { %v663_v24 = vpop.eup %662 }
 0x296   :  { %v386_v25 = vmul.f32 %v663_v24, %v895_v54 }
 0x298   :  { %v387_v26 = vmul.f32 %v799_v2, %v386_v25 }
 0x29a   :  { %v388_v27 = vadd.f32 %v806_v3, %v387_v26 }
 0x29c   :  { %389 = vst.msk [vmem:[#allocation7 + $0x2] sm:$0x3] %vm253_vm0, %v388_v27 }
 0x2c5   :  { %v534_v29 = vpop.permute.xlu1 %533 }
 0x2c6   :  { %v536_v57 = vsel %vm253_vm0, %v534_v29, 0.0 }
 0x2c9   :  { %v402_v30 = vpop.permute.xlu1 %401 }
 0x2ca   :  { %v404_v32 = vsel %vm253_vm0, %v402_v30, 0.0 }
 0x2cb   :  { %405 = vadd.xlane.f32.xlu1 %v404_v32 }
 0x2cd   :  { %v425_v34 = vpop.permute.xlu1 %424 }
 0x2ce   :  { %v427_v36 = vsel %vm253_vm0, %v425_v34, 0.0 }
 0x2cf   :  { %428 = vadd.xlane.f32.xlu1 %v427_v36 }
 0x2d1   :  { %v448_v9 = vpop.permute.xlu1 %447 }
 0x2d2   :  { %v450_v37 = vsel %vm253_vm0, %v448_v9, 0.0 }
 0x2d3   :  { %451 = vadd.xlane.f32.xlu1 %v450_v37 }
 0x2d5   :  { %v597_v58 = vpop.permute.xlu1 %596 }
 0x2d6   :  { %v599_v43 = vsel %vm253_vm0, %v597_v58, 0.0 }
 0x2f5   :  { %v554_v54 = vpop.xlane.xlu0 %553 }
 0x2f6   :  { %v555_v39 = vmul.f32 0.03125, %v554_v54 }
 0x2f8   :  { %v556_v40 = vadd.f32 1e-05, %v555_v39 }
 0x2f9   :  { %v295_v41 = vpop.permute.xlu0 %294 }
 0x2fa   :  { %664 = vrsqrt.f32 %v556_v40  ;;  %v297_v42 = vsel %vm253_vm0, %v295_v41, 0.0 }
 0x2fb   :  { %298 = vadd.xlane.f32.xlu0 %v297_v42 }
 0x2fd   :  { %v325_v44 = vpop.permute.xlu0 %324 }
 0x2fe   :  { %v327_v45 = vsel %vm253_vm0, %v325_v44, 0.0 }
 0x2ff   :  { %328 = vadd.xlane.f32.xlu0 %v327_v45 }
 0x301   :  { %v355_v47 = vpop.permute.xlu0 %354 }
 0x302   :  { %v357_v48 = vsel %vm253_vm0, %v355_v47, 0.0 }
 0x303   :  { %358 = vadd.xlane.f32.xlu0 %v357_v48 }
 0x305   :  { %v574_v49 = vpop.permute.xlu0 %573 }
 0x306   :  { %v576_v51 = vsel %vm253_vm0, %v574_v49, 0.0 }
 0x307   :  { %v665_v53 = vpop.eup %664  ;;  %514 = vadd.xlane.f32.xlu0 %v513_v50  ;;  %577 = vadd.xlane.f32.xlu1 %v576_v51 }
 0x308   :  { %v558_v55 = vmul.f32 %v665_v53, %v945_v38 }
 0x30a   :  { %v559_v56 = vmul.f32 %v799_v2, %v558_v55  ;;  %v617_v2 = vmul.f32 %v1003_v0, %v1003_v0 }
 0x30b   :  { %537 = vadd.xlane.f32.xlu0 %v536_v57 }
 0x30c   :  { %v560_v61 = vadd.f32 %v806_v3, %v559_v56 }
 0x30e   :  { %561 = vst.msk [vmem:[#allocation7 + $0x6] sm:$0x3] %vm253_vm0, %v560_v61 }
 0x30f   :  { %600 = vadd.xlane.f32.xlu0 %v599_v43 }
 0x312   :  { %v492_v1 = vpop.xlane.xlu1 %491 }
 0x313   :  { %v493_v38 = vmul.f32 0.03125, %v492_v1 }
 0x315   :  { %v494_v46 = vadd.f32 1e-05, %v493_v38 }
 0x317   :  { %666 = vrsqrt.f32 %v494_v46 }
 0x318   :  { %619 = vrot.lane.b32.xlu1 %v617_v2, %s759_s24 }
 0x324   :  { %v667_v3 = vpop.eup %666 }
 0x325   :  { %v496_v35 = vmul.f32 %v667_v3, %v901_v59 }
 0x327   :  { %v497_v8 = vmul.f32 %v496_v35, %v854_v10 }
 0x329   :  { %v498_v15 = vadd.f32 %v497_v8, %v856_v11 }
 0x32b   :  { %499 = vst.msk [vmem:[#allocation7 + $0x4] sm:$0x3] %vm312_vm1, %v498_v15 }
 0x354   :  { %v406_v6 = vpop.xlane.xlu1 %405 }
 0x355   :  { %v407_v18 = vmul.f32 0.03125, %v406_v6 }
 0x357   :  { %v408_v19 = vadd.f32 1e-05, %v407_v18 }
 0x358   :  { %v429_v21 = vpop.xlane.xlu1 %428 }
 0x359   :  { %668 = vrsqrt.f32 %v408_v19  ;;  %v430_v4 = vmul.f32 0.03125, %v429_v21 }
 0x35b   :  { %v431_v23 = vadd.f32 1e-05, %v430_v4 }
 0x35c   :  { %v452_v24 = vpop.xlane.xlu1 %451 }
 0x35d   :  { %670 = vrsqrt.f32 %v431_v23  ;;  %v453_v25 = vmul.f32 0.03125, %v452_v24 }
 0x35f   :  { %v454_v26 = vadd.f32 1e-05, %v453_v25 }
 0x361   :  { %672 = vrsqrt.f32 %v454_v26 }
 0x366   :  { %v669_v59 = vpop.eup %668 }
 0x367   :  { %v410_v27 = vmul.f32 %v669_v59, %v918_v22 }
 0x369   :  { %v411_v28 = vmul.f32 %v410_v27, %v854_v10 }
 0x36a   :  { %v671_v29 = vpop.eup %670 }
 0x36b   :  { %v412_v30 = vadd.f32 %v411_v28, %v856_v11  ;;  %v433_v32 = vmul.f32 %v671_v29, %v924_v5 }
 0x36d   :  { %v434_v34 = vmul.f32 %v433_v32, %v858_v12  ;;  %413 = vst.msk [vmem:[#allocation7 + $0x2] sm:$0x3] %vm312_vm1, %v412_v30 }
 0x36e   :  { %v673_v36 = vpop.eup %672 }
 0x36f   :  { %v435_v9 = vadd.f32 %v434_v34, %v860_v13  ;;  %v456_v37 = vmul.f32 %v673_v36, %v930_v31 }
 0x371   :  { %v457_v54 = vmul.f32 %v456_v37, %v862_v14  ;;  %436 = vst.msk [vmem:[#allocation7 + $0x2] sm:$0x3] %vm342_vm2, %v435_v9 }
 0x373   :  { %v458_v22 = vadd.f32 %v457_v54, %v866_v16 }
 0x375   :  { %459 = vst.msk [vmem:[#allocation7 + $0x2] sm:$0x3] %vm372_vm3, %v458_v22 }
 0x384   :  { %v299_v5 = vpop.xlane.xlu0 %298 }
 0x385   :  { %v300_v39 = vmul.f32 0.03125, %v299_v5 }
 0x387   :  { %v301_v40 = vadd.f32 1e-05, %v300_v39 }
 0x388   :  { %v329_v41 = vpop.xlane.xlu0 %328 }
 0x389   :  { %674 = vrsqrt.f32 %v301_v40  ;;  %v330_v42 = vmul.f32 0.03125, %v329_v41 }
 0x38b   :  { %v331_v44 = vadd.f32 1e-05, %v330_v42 }
 0x38c   :  { %v359_v45 = vpop.xlane.xlu0 %358 }
 0x38d   :  { %676 = vrsqrt.f32 %v331_v44  ;;  %v360_v47 = vmul.f32 0.03125, %v359_v45 }
 0x38f   :  { %v361_v31 = vadd.f32 1e-05, %v360_v47 }
 0x390   :  { %v578_v48 = vpop.xlane.xlu1 %577  ;;  %v515_v49 = vpop.xlane.xlu0 %514 }
 0x391   :  { %678 = vrsqrt.f32 %v361_v31  ;;  %v579_v50 = vmul.f32 0.03125, %v578_v48  ;;  %v516_v51 = vmul.f32 0.03125, %v515_v49 }
 0x393   :  { %v580_v53 = vadd.f32 1e-05, %v579_v50  ;;  %v517_v55 = vadd.f32 1e-05, %v516_v51 }
 0x394   :  { %v620_v56 = vpop.permute.xlu1 %619  ;;  %v538_v57 = vpop.xlane.xlu0 %537 }
 0x395   :  { %680 = vrsqrt.f32 %v580_v53  ;;  %v539_v58 = vmul.f32 0.03125, %v538_v57  ;;  %v622_v61 = vsel %vm253_vm0, %v620_v56, 0.0 }
 0x396   :  { %v675_v63 = vpop.eup %674  ;;  %682 = vrsqrt.f32 %v517_v55  ;;  %623 = vadd.xlane.f32.xlu1 %v622_v61 }
 0x397   :  { %v303_v43 = vmul.f32 %v675_v63, %v952_v52  ;;  %v540_v1 = vadd.f32 1e-05, %v539_v58 }
 0x398   :  { %v601_v38 = vpop.xlane.xlu0 %600 }
 0x399   :  { %v307_v46 = vmul.f32 %v854_v10, %v303_v43  ;;  %684 = vrsqrt.f32 %v540_v1  ;;  %v602_v2 = vmul.f32 0.03125, %v601_v38 }
 0x39a   :  { %v677_v3 = vpop.eup %676 }
 0x39b   :  { %v311_v35 = vadd.f32 %v856_v11, %v307_v46  ;;  %v333_v8 = vmul.f32 %v677_v3, %v958_v60  ;;  %v603_v15 = vadd.f32 1e-05, %v602_v2 }
 0x39d   :  { %v337_v6 = vmul.f32 %v858_v12, %v333_v8  ;;  %686 = vrsqrt.f32 %v603_v15  ;;  %313 = vst.msk [vmem:[#allocation7] sm:$0x3] %vm312_vm1, %v311_v35 }
 0x39e   :  { %v679_v18 = vpop.eup %678 }
 0x39f   :  { %v341_v52 = vadd.f32 %v860_v13, %v337_v6  ;;  %v363_v19 = vmul.f32 %v679_v18, %v967_v7 }
 0x3a1   :  { %v367_v21 = vmul.f32 %v862_v14, %v363_v19  ;;  %343 = vst.msk [vmem:[#allocation7] sm:$0x3] %vm342_vm2, %v341_v52 }
 0x3a2   :  { %v681_v4 = vpop.eup %680 }
 0x3a3   :  { %v683_v23 = vpop.eup %682  ;;  %v582_v24 = vmul.f32 %v681_v4, %v974_v20  ;;  %v371_v60 = vadd.f32 %v866_v16, %v367_v21 }
 0x3a4   :  { %v519_v25 = vmul.f32 %v683_v23, %v904_v62 }
 0x3a5   :  { %v583_v26 = vmul.f32 %v582_v24, %v854_v10  ;;  %373 = vst.msk [vmem:[#allocation7] sm:$0x3] %vm372_vm3, %v371_v60 }
 0x3a6   :  { %v685_v59 = vpop.eup %684  ;;  %v520_v27 = vmul.f32 %v519_v25, %v858_v12 }
 0x3a7   :  { %v584_v7 = vadd.f32 %v583_v26, %v856_v11  ;;  %v542_v28 = vmul.f32 %v685_v59, %v913_v17 }
 0x3a8   :  { %v521_v29 = vadd.f32 %v520_v27, %v860_v13 }
 0x3a9   :  { %v543_v30 = vmul.f32 %v542_v28, %v862_v14  ;;  %585 = vst.msk [vmem:[#allocation7 + $0x6] sm:$0x3] %vm312_vm1, %v584_v7 }
 0x3aa   :  { %v687_v20 = vpop.eup %686  ;;  %522 = vst.msk [vmem:[#allocation7 + $0x4] sm:$0x3] %vm342_vm2, %v521_v29 }
 0x3ab   :  { %v605_v10 = vmul.f32 %v687_v20, %v934_v33  ;;  %v544_v62 = vadd.f32 %v543_v30, %v866_v16 }
 0x3ad   :  { %v606_v32 = vmul.f32 %v605_v10, %v858_v12  ;;  %545 = vst.msk [vmem:[#allocation7 + $0x4] sm:$0x3] %vm372_vm3, %v544_v62 }
 0x3af   :  { %v607_v11 = vadd.f32 %v606_v32, %v860_v13 }
 0x3b1   :  { %608 = vst.msk [vmem:[#allocation7 + $0x6] sm:$0x3] %vm342_vm2, %v607_v11 }
 0x41f   :  { %v624_v17 = vpop.xlane.xlu1 %623 }
 0x420   :  { %v625_v34 = vmul.f32 0.03125, %v624_v17 }
 0x422   :  { %v626_v36 = vadd.f32 1e-05, %v625_v34 }
 0x424   :  { %688 = vrsqrt.f32 %v626_v36 }
 0x431   :  { %v689_v9 = vpop.eup %688 }
 0x432   :  { %v628_v37 = vmul.f32 %v689_v9, %v1003_v0 }
 0x434   :  { %v629_v33 = vmul.f32 %v628_v37, %v862_v14 }
 0x436   :  { %v630_v54 = vadd.f32 %v629_v33, %v866_v16 }
 0x438   :  { %631 = vst.msk [vmem:[#allocation7 + $0x6] sm:$0x3] %vm372_vm3, %v630_v54 }
 0x439   :  { %741 = shalt.err (!%p738_p0)
}
 0x43a   :  { %641 = dma.vmem_to_hbm [thread:$0]  %s639_s30, 128, %s1064_s4, [#allocation4]  }
 0x43b   :  { %754 = dma.done.wait [#allocation4], 128  }
 0x43c   :  { %755 = vsyncadd [#allocation4], 4294967168 }
 0x43d   :  { %645 = vsyncpa [#allocation3], 1 }
 0x43e   :  { %646 = vsyncpa [#allocation6], 1 }
 0x43f   :  { %647 = vsyncpa [#allocation4], 1 }

</bundles_post_ra>
